<compile_context>
chip_gen: v7x
topology: tpu7x:2x2x1
jax: 0.10.0
libtpu: 0.0.40
codegen_flags: <defaults>
</compile_context>

<pallas_src>
import functools
import math

import jax
import jax.numpy as jnp
import numpy as np
from jax.experimental import pallas as pl
from jax.experimental.pallas import tpu as pltpu


def _rasterizer_kernel(pts_ref, out_ref, *, h_0, w_0, r, sigma):
  """pts_ref: (B, 2*H) f32, whole array in SMEM.  out_ref: (1, H, W, W) f32 VMEM block."""
  b = pl.program_id(0)
  hs = out_ref.shape[1]
  W = out_ref.shape[2]

  neg_inv_2s2 = -1.0 / (2.0 * sigma * sigma)
  coef = 1.0 / (2.0 * math.pi * sigma * sigma)

  # Pixel-centre coordinates, shared by all trajectory points (hoisted out of the loop).
  # col varies along the lane axis (image column j), row along the sublane axis (row i).
  col = (jax.lax.broadcasted_iota(jnp.int32, (1, W), 1).astype(jnp.float32) - h_0) * r
  row = (jax.lax.broadcasted_iota(jnp.int32, (W, 1), 0).astype(jnp.float32) - w_0) * r

  for t in range(hs):  # hs is small & static -> fully unrolled, no loop-carried state
    px = pts_ref[b, 2 * t]        # scalar SMEM reads -> cheap splats, no lane slicing
    py = pts_ref[b, 2 * t + 1]
    dx = col - px                 # (1, W)
    dy = row - py                 # (W, 1)
    gx = jnp.exp(dx * dx * neg_inv_2s2)           # (1, W)  W exps on the EUP
    gy = coef * jnp.exp(dy * dy * neg_inv_2s2)    # (W, 1)  W exps, coef folded in
    out_ref[0, t, :, :] = gy * gx                 # rank-1 outer product -> (W, W)


@functools.partial(jax.jit, static_argnames=("width", "h_0", "w_0", "r", "sigma"))
def differential_rasterizer(points, *, width, h_0, w_0, r, sigma):
  bs, hs, two = points.shape
  assert two == 2
  # Keep (x, y) pairs adjacent and 2-D for cheap SMEM scalar indexing.
  pts_flat = points.reshape(bs, 2 * hs)

  kernel = functools.partial(
      _rasterizer_kernel, h_0=float(h_0), w_0=float(w_0), r=float(r), sigma=float(sigma))

  return pl.pallas_call(
      kernel,
      grid=(bs,),
      in_specs=[pl.BlockSpec(memory_space=pltpu.MemorySpace.SMEM)],
      out_specs=pl.BlockSpec((1, hs, width, width), lambda b: (b, 0, 0, 0)),
      out_shape=jax.ShapeDtypeStruct((bs, hs, width, width), jnp.float32),
      compiler_params=pltpu.CompilerParams(dimension_semantics=("parallel",)),
  )(pts_flat)


def _reference(points, width, h_0, w_0, r, sigma):
  """Pure-numpy re-implementation of the PyTorch forward."""
  pts = np.asarray(points, dtype=np.float32)
  bs, hs, _ = pts.shape
  rng = np.arange(width, dtype=np.float32)
  di = (rng.reshape(1, 1, 1, -1) - h_0) * r          # varies along j (last dim)
  dj = (rng.reshape(1, 1, -1, 1) - w_0) * r          # varies along i (dim 2)
  dx = di - pts[:, :, 0].reshape(bs, hs, 1, 1)
  dy = dj - pts[:, :, 1].reshape(bs, hs, 1, 1)
  coef = 1.0 / (2.0 * math.pi * sigma * sigma)
  return coef * np.exp(-(dx * dx + dy * dy) / (2.0 * sigma * sigma))


if __name__ == "__main__":
  batch = 2
  horizon = 8          # trajectory points -> output channels
  width = 128          # raster width (lane-dense output)
  h_0 = width / 2.0
  w_0 = width / 2.0
  r = 0.5
  sigma = 2.0

  key = jax.random.PRNGKey(0)
  points = 8.0 * jax.random.normal(key, (batch, horizon, 2), jnp.float32)

  out = differential_rasterizer(
      points, width=width, h_0=h_0, w_0=w_0, r=r, sigma=sigma)
  out = jax.block_until_ready(out)
  assert out.shape == (batch, horizon, width, width), out.shape

  ref = _reference(points, width, h_0, w_0, r, sigma)
  max_err = float(np.max(np.abs(np.asarray(out) - ref)))
  assert max_err < 1e-4, f"max abs error {max_err}"
  print("KERNEL_OK")
</pallas_src>

<mosaic_0001>
module attributes {stable_mosaic.version = 11 : i64} {
  func.func @_rasterizer_kernel(%arg0: i32, %arg1: memref<2x16xf32, #tpu.memory_space<smem>>, %arg2: memref<1x8x128x128xf32, #tpu.memory_space<vmem>>) attributes {dimension_semantics = [#tpu.dimension_semantics<parallel>], iteration_bounds = array<i64: 2>, scalar_prefetch = 0 : i64, scratch_operands = 0 : i64, tpu.core_type = #tpu.core_type<tc>, window_params = [{transform_indices = @transform_0, window_bounds = array<i64: 2, 16>}, {transform_indices = @transform_1, window_bounds = array<i64: 1, 8, 128, 128>}]} {
    %0 = tpu.iota {dimensions = array<i32: 1>} : vector<1x128xi32>
    %1 = arith.sitofp %0 : vector<1x128xi32> to vector<1x128xf32>
    %cst = arith.constant 6.400000e+01 : f32
    %2 = vector.broadcast %cst : f32 to vector<1x128xf32>
    %3 = arith.subf %1, %2 : vector<1x128xf32>
    %cst_0 = arith.constant 5.000000e-01 : f32
    %4 = vector.broadcast %cst_0 : f32 to vector<1x128xf32>
    %5 = arith.mulf %3, %4 : vector<1x128xf32>
    %6 = tpu.iota {dimensions = array<i32: 0>} : vector<128x1xi32>
    %7 = arith.sitofp %6 : vector<128x1xi32> to vector<128x1xf32>
    %cst_1 = arith.constant 6.400000e+01 : f32
    %8 = vector.broadcast %cst_1 : f32 to vector<128x1xf32>
    %9 = arith.subf %7, %8 : vector<128x1xf32>
    %cst_2 = arith.constant 5.000000e-01 : f32
    %10 = vector.broadcast %cst_2 : f32 to vector<128x1xf32>
    %11 = arith.mulf %9, %10 : vector<128x1xf32>
    %12 = arith.index_cast %arg0 : i32 to index
    %c0 = arith.constant 0 : index
    %13 = memref.load %arg1[%12, %c0] : memref<2x16xf32, #tpu.memory_space<smem>>
    %14 = arith.index_cast %arg0 : i32 to index
    %c1 = arith.constant 1 : index
    %15 = memref.load %arg1[%14, %c1] : memref<2x16xf32, #tpu.memory_space<smem>>
    %16 = vector.broadcast %13 : f32 to vector<1x128xf32>
    %17 = arith.subf %5, %16 : vector<1x128xf32>
    %18 = vector.broadcast %15 : f32 to vector<128x1xf32>
    %19 = arith.subf %11, %18 : vector<128x1xf32>
    %20 = arith.mulf %17, %17 : vector<1x128xf32>
    %cst_3 = arith.constant -1.250000e-01 : f32
    %21 = vector.broadcast %cst_3 : f32 to vector<1x128xf32>
    %22 = arith.mulf %20, %21 : vector<1x128xf32>
    %23 = math.exp %22 : vector<1x128xf32>
    %24 = arith.mulf %19, %19 : vector<128x1xf32>
    %cst_4 = arith.constant -1.250000e-01 : f32
    %25 = vector.broadcast %cst_4 : f32 to vector<128x1xf32>
    %26 = arith.mulf %24, %25 : vector<128x1xf32>
    %27 = math.exp %26 : vector<128x1xf32>
    %cst_5 = arith.constant 0.0397887342 : f32
    %28 = vector.broadcast %cst_5 : f32 to vector<128x1xf32>
    %29 = arith.mulf %28, %27 : vector<128x1xf32>
    %30 = vector.broadcast %29 : vector<128x1xf32> to vector<128x128xf32>
    %31 = vector.broadcast %23 : vector<1x128xf32> to vector<128x128xf32>
    %32 = arith.mulf %30, %31 : vector<128x128xf32>
    %c0_6 = arith.constant 0 : index
    %c0_7 = arith.constant 0 : index
    %c0_8 = arith.constant 0 : index
    %c0_9 = arith.constant 0 : index
    %33 = vector.load %arg2[%c0_6, %c0_7, %c0_8, %c0_9] : memref<1x8x128x128xf32, #tpu.memory_space<vmem>>, vector<1x1x128x128xf32>
    %34 = vector.shape_cast %33 : vector<1x1x128x128xf32> to vector<128x128xf32>
    %35 = vector.shape_cast %32 : vector<128x128xf32> to vector<1x1x128x128xf32>
    tpu.vector_store %arg2[%c0_6, %c0_7, %c0_8, %c0_9], %35 {strides = array<i32>} : memref<1x8x128x128xf32, #tpu.memory_space<vmem>>, vector<1x1x128x128xf32>,
    %36 = arith.index_cast %arg0 : i32 to index
    %c2 = arith.constant 2 : index
    %37 = memref.load %arg1[%36, %c2] : memref<2x16xf32, #tpu.memory_space<smem>>
    %38 = arith.index_cast %arg0 : i32 to index
    %c3 = arith.constant 3 : index
    %39 = memref.load %arg1[%38, %c3] : memref<2x16xf32, #tpu.memory_space<smem>>
    %40 = vector.broadcast %37 : f32 to vector<1x128xf32>
    %41 = arith.subf %5, %40 : vector<1x128xf32>
    %42 = vector.broadcast %39 : f32 to vector<128x1xf32>
    %43 = arith.subf %11, %42 : vector<128x1xf32>
    %44 = arith.mulf %41, %41 : vector<1x128xf32>
    %cst_10 = arith.constant -1.250000e-01 : f32
    %45 = vector.broadcast %cst_10 : f32 to vector<1x128xf32>
    %46 = arith.mulf %44, %45 : vector<1x128xf32>
    %47 = math.exp %46 : vector<1x128xf32>
    %48 = arith.mulf %43, %43 : vector<128x1xf32>
    %cst_11 = arith.constant -1.250000e-01 : f32
    %49 = vector.broadcast %cst_11 : f32 to vector<128x1xf32>
    %50 = arith.mulf %48, %49 : vector<128x1xf32>
    %51 = math.exp %50 : vector<128x1xf32>
    %cst_12 = arith.constant 0.0397887342 : f32
    %52 = vector.broadcast %cst_12 : f32 to vector<128x1xf32>
    %53 = arith.mulf %52, %51 : vector<128x1xf32>
    %54 = vector.broadcast %53 : vector<128x1xf32> to vector<128x128xf32>
    %55 = vector.broadcast %47 : vector<1x128xf32> to vector<128x128xf32>
    %56 = arith.mulf %54, %55 : vector<128x128xf32>
    %c0_13 = arith.constant 0 : index
    %c1_14 = arith.constant 1 : index
    %c0_15 = arith.constant 0 : index
    %c0_16 = arith.constant 0 : index
    %57 = vector.load %arg2[%c0_13, %c1_14, %c0_15, %c0_16] : memref<1x8x128x128xf32, #tpu.memory_space<vmem>>, vector<1x1x128x128xf32>
    %58 = vector.shape_cast %57 : vector<1x1x128x128xf32> to vector<128x128xf32>
    %59 = vector.shape_cast %56 : vector<128x128xf32> to vector<1x1x128x128xf32>
    tpu.vector_store %arg2[%c0_13, %c1_14, %c0_15, %c0_16], %59 {strides = array<i32>} : memref<1x8x128x128xf32, #tpu.memory_space<vmem>>, vector<1x1x128x128xf32>,
    %60 = arith.index_cast %arg0 : i32 to index
    %c4 = arith.constant 4 : index
    %61 = memref.load %arg1[%60, %c4] : memref<2x16xf32, #tpu.memory_space<smem>>
    %62 = arith.index_cast %arg0 : i32 to index
    %c5 = arith.constant 5 : index
    %63 = memref.load %arg1[%62, %c5] : memref<2x16xf32, #tpu.memory_space<smem>>
    %64 = vector.broadcast %61 : f32 to vector<1x128xf32>
    %65 = arith.subf %5, %64 : vector<1x128xf32>
    %66 = vector.broadcast %63 : f32 to vector<128x1xf32>
    %67 = arith.subf %11, %66 : vector<128x1xf32>
    %68 = arith.mulf %65, %65 : vector<1x128xf32>
    %cst_17 = arith.constant -1.250000e-01 : f32
    %69 = vector.broadcast %cst_17 : f32 to vector<1x128xf32>
    %70 = arith.mulf %68, %69 : vector<1x128xf32>
    %71 = math.exp %70 : vector<1x128xf32>
    %72 = arith.mulf %67, %67 : vector<128x1xf32>
    %cst_18 = arith.constant -1.250000e-01 : f32
    %73 = vector.broadcast %cst_18 : f32 to vector<128x1xf32>
    %74 = arith.mulf %72, %73 : vector<128x1xf32>
    %75 = math.exp %74 : vector<128x1xf32>
    %cst_19 = arith.constant 0.0397887342 : f32
    %76 = vector.broadcast %cst_19 : f32 to vector<128x1xf32>
    %77 = arith.mulf %76, %75 : vector<128x1xf32>
    %78 = vector.broadcast %77 : vector<128x1xf32> to vector<128x128xf32>
    %79 = vector.broadcast %71 : vector<1x128xf32> to vector<128x128xf32>
    %80 = arith.mulf %78, %79 : vector<128x128xf32>
    %c0_20 = arith.constant 0 : index
    %c2_21 = arith.constant 2 : index
    %c0_22 = arith.constant 0 : index
    %c0_23 = arith.constant 0 : index
    %81 = vector.load %arg2[%c0_20, %c2_21, %c0_22, %c0_23] : memref<1x8x128x128xf32, #tpu.memory_space<vmem>>, vector<1x1x128x128xf32>
    %82 = vector.shape_cast %81 : vector<1x1x128x128xf32> to vector<128x128xf32>
    %83 = vector.shape_cast %80 : vector<128x128xf32> to vector<1x1x128x128xf32>
    tpu.vector_store %arg2[%c0_20, %c2_21, %c0_22, %c0_23], %83 {strides = array<i32>} : memref<1x8x128x128xf32, #tpu.memory_space<vmem>>, vector<1x1x128x128xf32>,
    %84 = arith.index_cast %arg0 : i32 to index
    %c6 = arith.constant 6 : index
    %85 = memref.load %arg1[%84, %c6] : memref<2x16xf32, #tpu.memory_space<smem>>
    %86 = arith.index_cast %arg0 : i32 to index
    %c7 = arith.constant 7 : index
    %87 = memref.load %arg1[%86, %c7] : memref<2x16xf32, #tpu.memory_space<smem>>
    %88 = vector.broadcast %85 : f32 to vector<1x128xf32>
    %89 = arith.subf %5, %88 : vector<1x128xf32>
    %90 = vector.broadcast %87 : f32 to vector<128x1xf32>
    %91 = arith.subf %11, %90 : vector<128x1xf32>
    %92 = arith.mulf %89, %89 : vector<1x128xf32>
    %cst_24 = arith.constant -1.250000e-01 : f32
    %93 = vector.broadcast %cst_24 : f32 to vector<1x128xf32>
    %94 = arith.mulf %92, %93 : vector<1x128xf32>
    %95 = math.exp %94 : vector<1x128xf32>
    %96 = arith.mulf %91, %91 : vector<128x1xf32>
    %cst_25 = arith.constant -1.250000e-01 : f32
    %97 = vector.broadcast %cst_25 : f32 to vector<128x1xf32>
    %98 = arith.mulf %96, %97 : vector<128x1xf32>
    %99 = math.exp %98 : vector<128x1xf32>
    %cst_26 = arith.constant 0.0397887342 : f32
    %100 = vector.broadcast %cst_26 : f32 to vector<128x1xf32>
    %101 = arith.mulf %100, %99 : vector<128x1xf32>
    %102 = vector.broadcast %101 : vector<128x1xf32> to vector<128x128xf32>
    %103 = vector.broadcast %95 : vector<1x128xf32> to vector<128x128xf32>
    %104 = arith.mulf %102, %103 : vector<128x128xf32>
    %c0_27 = arith.constant 0 : index
    %c3_28 = arith.constant 3 : index
    %c0_29 = arith.constant 0 : index
    %c0_30 = arith.constant 0 : index
    %105 = vector.load %arg2[%c0_27, %c3_28, %c0_29, %c0_30] : memref<1x8x128x128xf32, #tpu.memory_space<vmem>>, vector<1x1x128x128xf32>
    %106 = vector.shape_cast %105 : vector<1x1x128x128xf32> to vector<128x128xf32>
    %107 = vector.shape_cast %104 : vector<128x128xf32> to vector<1x1x128x128xf32>
    tpu.vector_store %arg2[%c0_27, %c3_28, %c0_29, %c0_30], %107 {strides = array<i32>} : memref<1x8x128x128xf32, #tpu.memory_space<vmem>>, vector<1x1x128x128xf32>,
    %108 = arith.index_cast %arg0 : i32 to index
    %c8 = arith.constant 8 : index
    %109 = memref.load %arg1[%108, %c8] : memref<2x16xf32, #tpu.memory_space<smem>>
    %110 = arith.index_cast %arg0 : i32 to index
    %c9 = arith.constant 9 : index
    %111 = memref.load %arg1[%110, %c9] : memref<2x16xf32, #tpu.memory_space<smem>>
    %112 = vector.broadcast %109 : f32 to vector<1x128xf32>
    %113 = arith.subf %5, %112 : vector<1x128xf32>
    %114 = vector.broadcast %111 : f32 to vector<128x1xf32>
    %115 = arith.subf %11, %114 : vector<128x1xf32>
    %116 = arith.mulf %113, %113 : vector<1x128xf32>
    %cst_31 = arith.constant -1.250000e-01 : f32
    %117 = vector.broadcast %cst_31 : f32 to vector<1x128xf32>
    %118 = arith.mulf %116, %117 : vector<1x128xf32>
    %119 = math.exp %118 : vector<1x128xf32>
    %120 = arith.mulf %115, %115 : vector<128x1xf32>
    %cst_32 = arith.constant -1.250000e-01 : f32
    %121 = vector.broadcast %cst_32 : f32 to vector<128x1xf32>
    %122 = arith.mulf %120, %121 : vector<128x1xf32>
    %123 = math.exp %122 : vector<128x1xf32>
    %cst_33 = arith.constant 0.0397887342 : f32
    %124 = vector.broadcast %cst_33 : f32 to vector<128x1xf32>
    %125 = arith.mulf %124, %123 : vector<128x1xf32>
    %126 = vector.broadcast %125 : vector<128x1xf32> to vector<128x128xf32>
    %127 = vector.broadcast %119 : vector<1x128xf32> to vector<128x128xf32>
    %128 = arith.mulf %126, %127 : vector<128x128xf32>
    %c0_34 = arith.constant 0 : index
    %c4_35 = arith.constant 4 : index
    %c0_36 = arith.constant 0 : index
    %c0_37 = arith.constant 0 : index
    %129 = vector.load %arg2[%c0_34, %c4_35, %c0_36, %c0_37] : memref<1x8x128x128xf32, #tpu.memory_space<vmem>>, vector<1x1x128x128xf32>
    %130 = vector.shape_cast %129 : vector<1x1x128x128xf32> to vector<128x128xf32>
    %131 = vector.shape_cast %128 : vector<128x128xf32> to vector<1x1x128x128xf32>
    tpu.vector_store %arg2[%c0_34, %c4_35, %c0_36, %c0_37], %131 {strides = array<i32>} : memref<1x8x128x128xf32, #tpu.memory_space<vmem>>, vector<1x1x128x128xf32>,
    %132 = arith.index_cast %arg0 : i32 to index
    %c10 = arith.constant 10 : index
    %133 = memref.load %arg1[%132, %c10] : memref<2x16xf32, #tpu.memory_space<smem>>
    %134 = arith.index_cast %arg0 : i32 to index
    %c11 = arith.constant 11 : index
    %135 = memref.load %arg1[%134, %c11] : memref<2x16xf32, #tpu.memory_space<smem>>
    %136 = vector.broadcast %133 : f32 to vector<1x128xf32>
    %137 = arith.subf %5, %136 : vector<1x128xf32>
    %138 = vector.broadcast %135 : f32 to vector<128x1xf32>
    %139 = arith.subf %11, %138 : vector<128x1xf32>
    %140 = arith.mulf %137, %137 : vector<1x128xf32>
    %cst_38 = arith.constant -1.250000e-01 : f32
    %141 = vector.broadcast %cst_38 : f32 to vector<1x128xf32>
    %142 = arith.mulf %140, %141 : vector<1x128xf32>
    %143 = math.exp %142 : vector<1x128xf32>
    %144 = arith.mulf %139, %139 : vector<128x1xf32>
    %cst_39 = arith.constant -1.250000e-01 : f32
    %145 = vector.broadcast %cst_39 : f32 to vector<128x1xf32>
    %146 = arith.mulf %144, %145 : vector<128x1xf32>
    %147 = math.exp %146 : vector<128x1xf32>
    %cst_40 = arith.constant 0.0397887342 : f32
    %148 = vector.broadcast %cst_40 : f32 to vector<128x1xf32>
    %149 = arith.mulf %148, %147 : vector<128x1xf32>
    %150 = vector.broadcast %149 : vector<128x1xf32> to vector<128x128xf32>
    %151 = vector.broadcast %143 : vector<1x128xf32> to vector<128x128xf32>
    %152 = arith.mulf %150, %151 : vector<128x128xf32>
    %c0_41 = arith.constant 0 : index
    %c5_42 = arith.constant 5 : index
    %c0_43 = arith.constant 0 : index
    %c0_44 = arith.constant 0 : index
    %153 = vector.load %arg2[%c0_41, %c5_42, %c0_43, %c0_44] : memref<1x8x128x128xf32, #tpu.memory_space<vmem>>, vector<1x1x128x128xf32>
    %154 = vector.shape_cast %153 : vector<1x1x128x128xf32> to vector<128x128xf32>
    %155 = vector.shape_cast %152 : vector<128x128xf32> to vector<1x1x128x128xf32>
    tpu.vector_store %arg2[%c0_41, %c5_42, %c0_43, %c0_44], %155 {strides = array<i32>} : memref<1x8x128x128xf32, #tpu.memory_space<vmem>>, vector<1x1x128x128xf32>,
    %156 = arith.index_cast %arg0 : i32 to index
    %c12 = arith.constant 12 : index
    %157 = memref.load %arg1[%156, %c12] : memref<2x16xf32, #tpu.memory_space<smem>>
    %158 = arith.index_cast %arg0 : i32 to index
    %c13 = arith.constant 13 : index
    %159 = memref.load %arg1[%158, %c13] : memref<2x16xf32, #tpu.memory_space<smem>>
    %160 = vector.broadcast %157 : f32 to vector<1x128xf32>
    %161 = arith.subf %5, %160 : vector<1x128xf32>
    %162 = vector.broadcast %159 : f32 to vector<128x1xf32>
    %163 = arith.subf %11, %162 : vector<128x1xf32>
    %164 = arith.mulf %161, %161 : vector<1x128xf32>
    %cst_45 = arith.constant -1.250000e-01 : f32
    %165 = vector.broadcast %cst_45 : f32 to vector<1x128xf32>
    %166 = arith.mulf %164, %165 : vector<1x128xf32>
    %167 = math.exp %166 : vector<1x128xf32>
    %168 = arith.mulf %163, %163 : vector<128x1xf32>
    %cst_46 = arith.constant -1.250000e-01 : f32
    %169 = vector.broadcast %cst_46 : f32 to vector<128x1xf32>
    %170 = arith.mulf %168, %169 : vector<128x1xf32>
    %171 = math.exp %170 : vector<128x1xf32>
    %cst_47 = arith.constant 0.0397887342 : f32
    %172 = vector.broadcast %cst_47 : f32 to vector<128x1xf32>
    %173 = arith.mulf %172, %171 : vector<128x1xf32>
    %174 = vector.broadcast %173 : vector<128x1xf32> to vector<128x128xf32>
    %175 = vector.broadcast %167 : vector<1x128xf32> to vector<128x128xf32>
    %176 = arith.mulf %174, %175 : vector<128x128xf32>
    %c0_48 = arith.constant 0 : index
    %c6_49 = arith.constant 6 : index
    %c0_50 = arith.constant 0 : index
    %c0_51 = arith.constant 0 : index
    %177 = vector.load %arg2[%c0_48, %c6_49, %c0_50, %c0_51] : memref<1x8x128x128xf32, #tpu.memory_space<vmem>>, vector<1x1x128x128xf32>
    %178 = vector.shape_cast %177 : vector<1x1x128x128xf32> to vector<128x128xf32>
    %179 = vector.shape_cast %176 : vector<128x128xf32> to vector<1x1x128x128xf32>
    tpu.vector_store %arg2[%c0_48, %c6_49, %c0_50, %c0_51], %179 {strides = array<i32>} : memref<1x8x128x128xf32, #tpu.memory_space<vmem>>, vector<1x1x128x128xf32>,
    %180 = arith.index_cast %arg0 : i32 to index
    %c14 = arith.constant 14 : index
    %181 = memref.load %arg1[%180, %c14] : memref<2x16xf32, #tpu.memory_space<smem>>
    %182 = arith.index_cast %arg0 : i32 to index
    %c15 = arith.constant 15 : index
    %183 = memref.load %arg1[%182, %c15] : memref<2x16xf32, #tpu.memory_space<smem>>
    %184 = vector.broadcast %181 : f32 to vector<1x128xf32>
    %185 = arith.subf %5, %184 : vector<1x128xf32>
    %186 = vector.broadcast %183 : f32 to vector<128x1xf32>
    %187 = arith.subf %11, %186 : vector<128x1xf32>
    %188 = arith.mulf %185, %185 : vector<1x128xf32>
    %cst_52 = arith.constant -1.250000e-01 : f32
    %189 = vector.broadcast %cst_52 : f32 to vector<1x128xf32>
    %190 = arith.mulf %188, %189 : vector<1x128xf32>
    %191 = math.exp %190 : vector<1x128xf32>
    %192 = arith.mulf %187, %187 : vector<128x1xf32>
    %cst_53 = arith.constant -1.250000e-01 : f32
    %193 = vector.broadcast %cst_53 : f32 to vector<128x1xf32>
    %194 = arith.mulf %192, %193 : vector<128x1xf32>
    %195 = math.exp %194 : vector<128x1xf32>
    %cst_54 = arith.constant 0.0397887342 : f32
    %196 = vector.broadcast %cst_54 : f32 to vector<128x1xf32>
    %197 = arith.mulf %196, %195 : vector<128x1xf32>
    %198 = vector.broadcast %197 : vector<128x1xf32> to vector<128x128xf32>
    %199 = vector.broadcast %191 : vector<1x128xf32> to vector<128x128xf32>
    %200 = arith.mulf %198, %199 : vector<128x128xf32>
    %c0_55 = arith.constant 0 : index
    %c7_56 = arith.constant 7 : index
    %c0_57 = arith.constant 0 : index
    %c0_58 = arith.constant 0 : index
    %201 = vector.load %arg2[%c0_55, %c7_56, %c0_57, %c0_58] : memref<1x8x128x128xf32, #tpu.memory_space<vmem>>, vector<1x1x128x128xf32>
    %202 = vector.shape_cast %201 : vector<1x1x128x128xf32> to vector<128x128xf32>
    %203 = vector.shape_cast %200 : vector<128x128xf32> to vector<1x1x128x128xf32>
    tpu.vector_store %arg2[%c0_55, %c7_56, %c0_57, %c0_58], %203 {strides = array<i32>} : memref<1x8x128x128xf32, #tpu.memory_space<vmem>>, vector<1x1x128x128xf32>,
    return
  }
  func.func @transform_0(%arg0: i32) -> (i32, i32) {
    %c0_i32 = arith.constant 0 : i32
    %c0_i32_0 = arith.constant 0 : i32
    %c0_i32_1 = arith.constant 0 : i32
    return %c0_i32, %c0_i32_0 : i32, i32
  }
  func.func @transform_1(%arg0: i32) -> (i32, i32, i32, i32) {
    %c0_i32 = arith.constant 0 : i32
    %c0_i32_0 = arith.constant 0 : i32
    %c0_i32_1 = arith.constant 0 : i32
    %c0_i32_2 = arith.constant 0 : i32
    return %arg0, %c0_i32, %c0_i32_0, %c0_i32_1 : i32, i32, i32, i32
  }
}

</mosaic_0001>

<bundles_post_ra>
// kernel: differential_rasterizer.1
= control target key start
LH: loop header
LB: loop body
LE: loop exit
PB: predicated region body
PF: predicated region fallthrough
CT: control target
= control target key end

     0   :  { %6 = vsyncpa [#allocation4], 0  ;;  %s2727_s0 = inlined_call_operand.vmem [shape: f32[2,16], index: 0, kind: input, shape index: {}]   ;;  %s2728_s1 = inlined_call_operand.hbm [shape: f32[2,8,128,128], index: 1, kind: output, shape index: {}]  }
   0x1   :  { %7 = vsyncpa [#allocation3], 0 }
   0x2   :  { %9 = vsyncpa [#allocation3 + $0x1], 0  ;;  %s1937_s6 = smov 0   ;;  %s1939_s7 = smov 0  }
   0x3   :  { %s1941_s8 = smov 0   ;;  %s1943_s9 = smov 0  }
   0x4 LB: > { %s1958_s10 = sadd.s32 4294967295, %s1921_s9   ;;  %s1374_s11 = sadd.s32 4294967294, %s1921_s9   ;;  %s1921_s9 = sphi %s1943_s9, %s2735_s9   ;;  %s1917_s8 = sphi %s1941_s8, %s2734_s8   ;;  %s1913_s7 = sphi %s1939_s7, %s2733_s7   ;;  %s1909_s6 = sphi %s1937_s6, %s2732_s6  }
   0x5   : > { %s1962_s12 = sadd.s32 1, %s1921_s9   ;;  %s43_s13 = sadd.s32 1, %s1917_s8 }
   0x6   : > { %s40_s14 = ssub.s32 %s1921_s9, %s1962_s12  ;;  %p53_p0 = scmp.ne.s32.totalorder %s1917_s8, %s1913_s7 }
   0x7   : > { %p41_p1 = scmp.eq.s32.totalorder %s40_s14, 0  ;;  %p54_p2 = scmp.eq.s32.totalorder %s1958_s10, 1 }
   0x8   : > { %p59_p3 = scmp.ne.s32.totalorder %s1913_s7, %s1909_s6  ;;  %p60_p4 = scmp.eq.s32.totalorder %s1374_s11, 1 }
   0x9   : > { %s1973_s15 = scalar_select %p41_p1, %s1917_s8, %s43_s13  }
   0xa   : > { %p1975_p5 = por %p54_p2, %p53_p0  ;;  %p1979_p6 = por %p60_p4, %p59_p3 }
   0xb   : > { %p1375_p7 = scmp.ge.s32.totalorder %s1921_s9, 1  ;;  %p67_p8 = scmp.lt.s32.totalorder %s1921_s9, 3 }
   0xc   : > { %p1530_p9 = scmp.eq.s32.totalorder %s1958_s10, 0  ;;  %s80_s21 = sshll.u32 %s2727_s0, 4  ;;  %s81_s21 = int_to_ptr.vmem [resolvable:$true] %s80_s21 }
   0xd   : > { %p1986_p10 = pnand %p1375_p7, %p67_p8  ;;  %s1840_s22 = scalar_lea.vmem %s81_s21, 32 }
   0xe   : > { %p1841_p13 = scmp.ne.s32.totalorder %s81_s21, %s1840_s22  ;;  %p1848_p3 = scmp.lt.s32.totalorder %s81_s21, %s81_s21 }
   0xf   : > { %p1522_p11 = pneg %p1986_p10  ;;  %p1849_p4 = scmp.lt.s32.totalorder %s1840_s22, %s1840_s22 }
  0x11   : > { %p1523_p12 = pnand %p1530_p9, %p1522_p11  ;;  %p1850_p7 = por %p1849_p4, %p1848_p3 }
  0x13   : > { %p1842_p0 = pneg %p1523_p12 }
  0x15   : > { %p1843_p1 = pnand %p1842_p0, %p1841_p13 }
  0x17   : > { %p1844_p2 = pneg %p1843_p1 }
  0x19   : > { %p1851_p8 = pnand %p1850_p7, %p1844_p2 }
  0x1b   : > { %1854 = shalt.err (!%p1851_p8)
}
  0x1c   : > { %s1923_s23 = smov [#allocation2]   ;;  %93 = sbr.rel (%p1986_p10) target bundleno = 325 (0x145), region = 24 }
  0x1d   : > { %1525 = dma.vmem_to_smem (!%p1523_p12), %s81_s21, 32, %s1923_s23, [#allocation4]  }
  0x23   : > { %1900 = dma.done.wait (%p1530_p9), [#allocation4], 32  }
  0x24   : > { %1902 = vsyncadd (%p1530_p9), [#allocation4], 4294967264 }
  0x25   : > { %99 = sfence }
  0x26   : > { %v109_v0 = vlaneseq  ;;  %s2004_s24 = sshll.u32 %s1958_s10, 7  ;;  %s106_s22 = sand.u32 1, %s1913_s7  }
  0x27   : > { %s2007_s25 = sld [smem:[#allocation2 + %s2004_s24]]  ;;  %s181_s26 = sadd.s32 1, %s2004_s24 }
  0x28   : > { %v110_v1 = vand.u32 127, %v109_v0  ;;  %v2009_v2 = vshrl.u32 %v109_v0, 7  ;;  %s2012_s27 = sld [smem:[#allocation2 + %s181_s26]]  ;;  %s318_s28 = sadd.s32 2, %s2004_s24 }
  0x29   : > { %s2016_s29 = sld [smem:[#allocation2 + %s318_s28]]  ;;  %s458_s30 = sadd.s32 4, %s2004_s24 }
  0x2a   : > { %v111_v3 = vcvt.s32.f32 %v110_v1  ;;  %v131_v4 = vcvt.s32.f32 %v2009_v2  ;;  %v116_v5 = vadd.s32 8, %v2009_v2  ;;  %v117_v6 = vadd.s32 16, %v2009_v2  ;;  %s2021_s2 = sld [smem:[#allocation2 + %s458_s30]]  ;;  %s598_s3 = sadd.s32 6, %s2004_s24 }
  0x2b   : > { %v118_v7 = vadd.s32 24, %v2009_v2  ;;  %v119_v8 = vadd.s32 32, %v2009_v2  ;;  %v120_v9 = vadd.s32 40, %v2009_v2  ;;  %v2028_v10 = vadd.s32 48, %v2009_v2  ;;  %s2030_s4 = sld [smem:[#allocation2 + %s598_s3]]  ;;  %s738_s5 = sadd.s32 8, %s2004_s24 }
  0x2c   : > { %v1380_v11 = vadd.f32 -64.0, %v111_v3  ;;  %v1381_v12 = vadd.f32 -64.0, %v131_v4  ;;  %v132_v13 = vcvt.s32.f32 %v116_v5  ;;  %v133_v14 = vcvt.s32.f32 %v117_v6  ;;  %s2034_s11 = sld [smem:[#allocation2 + %s738_s5]]  ;;  %s878_s13 = sadd.s32 10, %s2004_s24 }
  0x2d   : > { %v183_v15 = vstv %s2007_s25  ;;  %v134_v16 = vcvt.s32.f32 %v118_v7  ;;  %v135_v17 = vcvt.s32.f32 %v119_v8  ;;  %v136_v18 = vcvt.s32.f32 %v120_v9  ;;  %s2039_s14 = sld [smem:[#allocation2 + %s878_s13]]  ;;  %s1018_s18 = sadd.s32 12, %s2004_s24 }
  0x2e   : > { %v113_v19 = vmul.f32 0.5, %v1380_v11  ;;  %v2037_v20 = vmul.f32 0.5, %v1381_v12  ;;  %v1382_v21 = vadd.f32 -64.0, %v132_v13  ;;  %v1383_v22 = vadd.f32 -64.0, %v133_v14  ;;  %s2045_s19 = sld [smem:[#allocation2 + %s1018_s18]]  ;;  %s1158_s20 = sadd.s32 14, %s2004_s24 }
  0x2f   : > { %v2043_v23 = vstv %s2012_s27  ;;  %v1384_v24 = vadd.f32 -64.0, %v134_v16  ;;  %v1385_v25 = vadd.f32 -64.0, %v135_v17  ;;  %v2048_v26 = vadd.f32 -64.0, %v136_v18  ;;  %s2053_s21 = sld [smem:[#allocation2 + %s1158_s20]]  ;;  %s1379_s23 = sshll.u32 %s106_s22, 10 }
  0x30   : > { %v184_v27 = vsub.f32 %v113_v19, %v183_v15  ;;  %v186_v28 = vsub.f32 %v2037_v20, %v2043_v23  ;;  %v322_v29 = vstv %s2016_s29  ;;  %v2055_v30 = vmul.f32 0.5, %v1382_v21  ;;  %s2105_s25 = scalar_lea.vmem [#allocation5], %s1379_s23  ;;  %s320_s26 = sadd.s32 3, %s2004_s24 }
  0x31   : > { %v323_v31 = vsub.f32 %v113_v19, %v322_v29  ;;  %v462_v32 = vstv %s2021_s2  ;;  %v2058_v33 = vmul.f32 0.5, %v1383_v22  ;;  %v2060_v34 = vmul.f32 0.5, %v1384_v24  ;;  %s2137_s27 = sld [smem:[#allocation2 + %s320_s26]]  ;;  %s460_s28 = sadd.s32 5, %s2004_s24 }
  0x32   : > { %v202_v35 = vmul.f32 %v184_v27, %v184_v27  ;;  %v206_v36 = vmul.f32 %v186_v28, %v186_v28  ;;  %v463_v37 = vsub.f32 %v113_v19, %v462_v32  ;;  %v602_v38 = vstv %s2030_s4  ;;  %s2210_s29 = sld [smem:[#allocation2 + %s460_s28]]  ;;  %s600_s30 = sadd.s32 7, %s2004_s24 }
  0x33   : > { %v341_v39 = vmul.f32 %v323_v31, %v323_v31  ;;  %v603_v40 = vsub.f32 %v113_v19, %v602_v38  ;;  %v742_v41 = vstv %s2034_s11  ;;  %v187_v42 = vsub.f32 %v2055_v30, %v2043_v23  ;;  %s2292_s2 = sld [smem:[#allocation2 + %s600_s30]]  ;;  %s740_s3 = sadd.s32 9, %s2004_s24 }
  0x34   : > { %v203_v43 = vmul.f32 -0.125, %v202_v35  ;;  %v222_v44 = vmul.f32 -0.125, %v206_v36  ;;  %v481_v45 = vmul.f32 %v463_v37, %v463_v37  ;;  %v743_v46 = vsub.f32 %v113_v19, %v742_v41  ;;  %s2353_s4 = sld [smem:[#allocation2 + %s740_s3]]  ;;  %s880_s5 = sadd.s32 11, %s2004_s24 }
  0x35   : > { %v342_v47 = vmul.f32 -0.125, %v341_v39  ;;  %v621_v48 = vmul.f32 %v603_v40, %v603_v40  ;;  %v882_v49 = vstv %s2039_s14  ;;  %v1022_v50 = vstv %s2045_s19  ;;  %s2417_s11 = sld [smem:[#allocation2 + %s880_s5]]  ;;  %s1020_s13 = sadd.s32 13, %s2004_s24 }
  0x36   : > { %v204_v51 = vmul.f32 1.442695, %v203_v43  ;;  %v238_v52 = vmul.f32 1.442695, %v222_v44  ;;  %v482_v53 = vmul.f32 -0.125, %v481_v45  ;;  %v761_v54 = vmul.f32 %v743_v46, %v743_v46  ;;  %s2501_s14 = sld [smem:[#allocation2 + %s1020_s13]] }
  0x37   : > { %v343_v55 = vmul.f32 1.442695, %v342_v47  ;;  %v622_v56 = vmul.f32 -0.125, %v621_v48  ;;  %v883_v57 = vsub.f32 %v113_v19, %v882_v49  ;;  %v1023_v58 = vsub.f32 %v113_v19, %v1022_v50  ;;  %s1160_s18 = sadd.s32 15, %s2004_s24  ;;  %s1515_s19 = sshll.u32 %s1958_s10, 14 }
  0x38   : > { %1568 = vpow2.f32 %v204_v51  ;;  %v483_v59 = vmul.f32 1.442695, %v482_v53  ;;  %v762_v60 = vmul.f32 -0.125, %v761_v54  ;;  %v1162_v61 = vstv %s2053_s21  ;;  %s2569_s24 = sld [smem:[#allocation2 + %s1160_s18]]  ;;  %s1312_s20 = sshll.u32 %s2105_s25, 4  ;;  %s2678_s20 = int_to_ptr.vmem [resolvable:$true] %s1312_s20 }
  0x39   : > { %1570 = vpow2.f32 %v238_v52  ;;  %v623_v62 = vmul.f32 1.442695, %v622_v56  ;;  %v901_v63 = vmul.f32 %v883_v57, %v883_v57  ;;  %v1041_v0 = vmul.f32 %v1023_v58, %v1023_v58  ;;  %s2676_s26 = scalar_lea.hbm %s2728_s1, %s1515_s19  ;;  %s2686_s10 = scalar_lea.sflag [#allocation3], %s106_s22 }
  0x3a   : > { %1572 = vpow2.f32 %v343_v55  ;;  %v763_v1 = vmul.f32 1.442695, %v762_v60  ;;  %v1163_v3 = vsub.f32 %v113_v19, %v1162_v61  ;;  %v207_v4 = vmul.f32 %v187_v42, %v187_v42  ;;  %s1924_s28 = smov [#allocation5]  }
  0x3b   : > { %1574 = vpow2.f32 %v483_v59  ;;  %v902_v5 = vmul.f32 -0.125, %v901_v63  ;;  %v1042_v6 = vmul.f32 -0.125, %v1041_v0  ;;  %v188_v7 = vsub.f32 %v2058_v33, %v2043_v23 }
  0x3c   : > { %1576 = vpow2.f32 %v623_v62  ;;  %v1181_v8 = vmul.f32 %v1163_v3, %v1163_v3  ;;  %v223_v9 = vmul.f32 -0.125, %v207_v4  ;;  %v189_v11 = vsub.f32 %v2060_v34, %v2043_v23 }
  0x3d   : > { %1578 = vpow2.f32 %v763_v1  ;;  %v903_v12 = vmul.f32 1.442695, %v902_v5  ;;  %v1043_v13 = vmul.f32 1.442695, %v1042_v6  ;;  %v208_v14 = vmul.f32 %v188_v7, %v188_v7 }
  0x3e   : > { %v1182_v15 = vmul.f32 -0.125, %v1181_v8  ;;  %v240_v16 = vmul.f32 1.442695, %v223_v9  ;;  %v209_v17 = vmul.f32 %v189_v11, %v189_v11  ;;  %v2073_v18 = vmul.f32 0.5, %v1385_v25 }
  0x3f   : > { %1580 = vpow2.f32 %v903_v12  ;;  %v224_v19 = vmul.f32 -0.125, %v208_v14  ;;  %v2077_v21 = vmul.f32 0.5, %v2048_v26  ;;  %v137_v22 = vcvt.s32.f32 %v2028_v10 }
  0x40   : > { %1582 = vpow2.f32 %v1043_v13  ;;  %v1183_v24 = vmul.f32 1.442695, %v1182_v15  ;;  %v225_v27 = vmul.f32 -0.125, %v209_v17  ;;  %v190_v28 = vsub.f32 %v2073_v18, %v2043_v23 }
  0x41   : > { %1584 = vpow2.f32 %v240_v16  ;;  %v242_v29 = vmul.f32 1.442695, %v224_v19  ;;  %v191_v25 = vsub.f32 %v2077_v21, %v2043_v23  ;;  %v1387_v31 = vadd.f32 -64.0, %v137_v22 }
  0x42   : > { %v2084_v32 = vpop.eup %1568  ;;  %1586 = vpow2.f32 %v1183_v24  ;;  %v244_v26 = vmul.f32 1.442695, %v225_v27  ;;  %v210_v35 = vmul.f32 %v190_v28, %v190_v28  ;;  %v122_v10 = vadd.s32 56, %v2009_v2 }
  0x43   : > { %v1571_v36 = vpop.eup %1570  ;;  %1588 = vpow2.f32 %v242_v29  ;;  %v211_v37 = vmul.f32 %v191_v25, %v191_v25  ;;  %v2089_v38 = vmul.f32 0.5, %v1387_v31  ;;  %v123_v39 = vadd.s32 64, %v2009_v2 }
  0x44   : > { %v2092_v40 = vpop.eup %1572  ;;  %v270_v41 = vmul.f32 0.039788734, %v1571_v36  ;;  %1590 = vpow2.f32 %v244_v26  ;;  %v226_v42 = vmul.f32 -0.125, %v210_v35  ;;  %v138_v43 = vcvt.s32.f32 %v122_v10 }
  0x45   : > { %v2094_v44 = vpop.eup %1574  ;;  %v227_v45 = vmul.f32 -0.125, %v211_v37  ;;  %v192_v46 = vsub.f32 %v2089_v38, %v2043_v23  ;;  %v139_v47 = vcvt.s32.f32 %v123_v39  ;;  %v124_v48 = vadd.s32 72, %v2009_v2 }
  0x46   : > { %v2099_v49 = vpop.eup %1576  ;;  %v286_v50 = vmul.f32 %v2084_v32, %v270_v41  ;;  %v246_v51 = vmul.f32 1.442695, %v226_v42  ;;  %v1388_v52 = vadd.f32 -64.0, %v138_v43  ;;  %v125_v53 = vadd.s32 80, %v2009_v2 }
  0x47   : > { %v2103_v54 = vpop.eup %1578  ;;  %v248_v55 = vmul.f32 1.442695, %v227_v45  ;;  %v212_v56 = vmul.f32 %v192_v46, %v192_v46  ;;  %v1389_v57 = vadd.f32 -64.0, %v139_v47  ;;  %v140_v58 = vcvt.s32.f32 %v124_v48 }
  0x48   : > { %302 = vst [vmem:[%s2105_s25] sm:$0xff] %v286_v50  ;;  %1592 = vpow2.f32 %v246_v51  ;;  %v2108_v59 = vmul.f32 0.5, %v1388_v52  ;;  %v141_v60 = vcvt.s32.f32 %v125_v53  ;;  %v126_v61 = vadd.s32 88, %v2009_v2 }
  0x49   : > { %v2111_v62 = vpop.eup %1580  ;;  %1594 = vpow2.f32 %v248_v55  ;;  %v228_v63 = vmul.f32 -0.125, %v212_v56  ;;  %v2113_v0 = vmul.f32 0.5, %v1389_v57  ;;  %v1390_v1 = vadd.f32 -64.0, %v140_v58 }
  0x4a   : > { %v2115_v3 = vpop.eup %1582  ;;  %v193_v4 = vsub.f32 %v2108_v59, %v2043_v23  ;;  %v1391_v5 = vadd.f32 -64.0, %v141_v60  ;;  %v142_v6 = vcvt.s32.f32 %v126_v61  ;;  %v127_v7 = vadd.s32 96, %v2009_v2 }
  0x4b   : > { %v1585_v8 = vpop.eup %1584  ;;  %v250_v9 = vmul.f32 1.442695, %v228_v63  ;;  %v194_v11 = vsub.f32 %v2113_v0, %v2043_v23  ;;  %v2122_v12 = vmul.f32 0.5, %v1390_v1  ;;  %v128_v13 = vadd.s32 104, %v2009_v2 }
  0x4c   : > { %v2125_v14 = vpop.eup %1586  ;;  %v271_v15 = vmul.f32 0.039788734, %v1585_v8  ;;  %v213_v16 = vmul.f32 %v193_v4, %v193_v4  ;;  %v2127_v17 = vmul.f32 0.5, %v1391_v5  ;;  %v1392_v19 = vadd.f32 -64.0, %v142_v6 }
  0x4d   : > { %v1589_v22 = vpop.eup %1588  ;;  %1596 = vpow2.f32 %v250_v9  ;;  %v214_v24 = vmul.f32 %v194_v11, %v194_v11  ;;  %v195_v27 = vsub.f32 %v2122_v12, %v2043_v23  ;;  %v143_v28 = vcvt.s32.f32 %v127_v7 }
  0x4e   : > { %v1591_v29 = vpop.eup %1590  ;;  %v287_v25 = vmul.f32 %v2084_v32, %v271_v15  ;;  %v272_v31 = vmul.f32 0.039788734, %v1589_v22  ;;  %v229_v26 = vmul.f32 -0.125, %v213_v16  ;;  %v196_v35 = vsub.f32 %v2127_v17, %v2043_v23 }
  0x4f   : > { %v273_v10 = vmul.f32 0.039788734, %v1591_v29  ;;  %v230_v36 = vmul.f32 -0.125, %v214_v24  ;;  %v215_v37 = vmul.f32 %v195_v27, %v195_v27  ;;  %v2135_v39 = vmul.f32 0.5, %v1392_v19 }
  0x50   : > { %303 = vst [vmem:[%s2105_s25 + $0x8] sm:$0xff] %v287_v25  ;;  %v288_v41 = vmul.f32 %v2084_v32, %v272_v31  ;;  %v252_v42 = vmul.f32 1.442695, %v229_v26  ;;  %v216_v43 = vmul.f32 %v196_v35, %v196_v35  ;;  %v1393_v45 = vadd.f32 -64.0, %v143_v28 }
  0x51   : > { %v289_v46 = vmul.f32 %v2084_v32, %v273_v10  ;;  %v254_v47 = vmul.f32 1.442695, %v230_v36  ;;  %v231_v48 = vmul.f32 -0.125, %v215_v37  ;;  %v197_v50 = vsub.f32 %v2135_v39, %v2043_v23 }
  0x52   : > { %v1593_v51 = vpop.eup %1592  ;;  %304 = vst [vmem:[%s2105_s25 + $0x10] sm:$0xff] %v288_v41  ;;  %1598 = vpow2.f32 %v252_v42  ;;  %v232_v52 = vmul.f32 -0.125, %v216_v43  ;;  %v2145_v53 = vmul.f32 0.5, %v1393_v45  ;;  %v144_v55 = vcvt.s32.f32 %v128_v13 }
  0x53   : > { %v1595_v56 = vpop.eup %1594  ;;  %305 = vst [vmem:[%s2105_s25 + $0x18] sm:$0xff] %v289_v46  ;;  %v274_v57 = vmul.f32 0.039788734, %v1593_v51  ;;  %1600 = vpow2.f32 %v254_v47  ;;  %v256_v58 = vmul.f32 1.442695, %v231_v48  ;;  %v217_v60 = vmul.f32 %v197_v50, %v197_v50 }
  0x54   : > { %v275_v61 = vmul.f32 0.039788734, %v1595_v56  ;;  %v258_v63 = vmul.f32 1.442695, %v232_v52  ;;  %v198_v1 = vsub.f32 %v2145_v53, %v2043_v23  ;;  %v1394_v4 = vadd.f32 -64.0, %v144_v55 }
  0x55   : > { %v290_v5 = vmul.f32 %v2084_v32, %v274_v57  ;;  %1602 = vpow2.f32 %v256_v58  ;;  %v233_v6 = vmul.f32 -0.125, %v217_v60  ;;  %v129_v7 = vadd.s32 112, %v2009_v2 }
  0x56   : > { %v291_v8 = vmul.f32 %v2084_v32, %v275_v61  ;;  %1604 = vpow2.f32 %v258_v63  ;;  %v218_v9 = vmul.f32 %v198_v1, %v198_v1  ;;  %v2153_v11 = vmul.f32 0.5, %v1394_v4 }
  0x57   : > { %v1597_v13 = vpop.eup %1596  ;;  %306 = vst [vmem:[%s2105_s25 + $0x20] sm:$0xff] %v290_v5  ;;  %v260_v15 = vmul.f32 1.442695, %v233_v6  ;;  %v145_v16 = vcvt.s32.f32 %v129_v7  ;;  %v130_v19 = vadd.s32 120, %v2009_v2  ;;  %v2158_v22 = vstv %s2137_s27  ;;  %s1855_s27 = scalar_lea.vmem %s2678_s20, 16384 }
  0x58   : > { %307 = vst [vmem:[%s2105_s25 + $0x28] sm:$0xff] %v291_v8  ;;  %v276_v24 = vmul.f32 0.039788734, %v1597_v13  ;;  %v234_v27 = vmul.f32 -0.125, %v218_v9  ;;  %v199_v28 = vsub.f32 %v2153_v11, %v2043_v23  ;;  %v325_v29 = vsub.f32 %v2037_v20, %v2158_v22  ;;  %p1856_p9 = scmp.ne.s32.totalorder %s2678_s20, %s1855_s27 }
  0x59   : > { %1606 = vpow2.f32 %v260_v15  ;;  %v1395_v25 = vadd.f32 -64.0, %v145_v16  ;;  %v146_v31 = vcvt.s32.f32 %v130_v19  ;;  %v326_v26 = vsub.f32 %v2055_v30, %v2158_v22 }
  0x5a   : > { %v292_v2 = vmul.f32 %v2084_v32, %v276_v24  ;;  %v262_v35 = vmul.f32 1.442695, %v234_v27  ;;  %v219_v10 = vmul.f32 %v199_v28, %v199_v28  ;;  %v345_v36 = vmul.f32 %v325_v29, %v325_v29  ;;  %p1857_p10 = pnand %p1856_p9, %p1975_p5 }
  0x5b   : > { %v2168_v37 = vmul.f32 0.5, %v1395_v25  ;;  %v1396_v41 = vadd.f32 -64.0, %v146_v31  ;;  %v346_v42 = vmul.f32 %v326_v26, %v326_v26  ;;  %v327_v43 = vsub.f32 %v2058_v33, %v2158_v22 }
  0x5c   : > { %v1599_v45 = vpop.eup %1598  ;;  %308 = vst [vmem:[%s2105_s25 + $0x30] sm:$0xff] %v292_v2  ;;  %1608 = vpow2.f32 %v262_v35  ;;  %v235_v46 = vmul.f32 -0.125, %v219_v10  ;;  %v361_v47 = vmul.f32 -0.125, %v345_v36  ;;  %v328_v48 = vsub.f32 %v2060_v34, %v2158_v22  ;;  %p1858_p11 = pneg %p1857_p10 }
  0x5d   : > { %v1601_v50 = vpop.eup %1600  ;;  %v277_v51 = vmul.f32 0.039788734, %v1599_v45  ;;  %v200_v52 = vsub.f32 %v2168_v37, %v2043_v23  ;;  %v2177_v55 = vmul.f32 0.5, %v1396_v41  ;;  %v362_v56 = vmul.f32 -0.125, %v346_v42 }
  0x5e   : > { %v278_v57 = vmul.f32 0.039788734, %v1601_v50  ;;  %v264_v58 = vmul.f32 1.442695, %v235_v46  ;;  %v377_v60 = vmul.f32 1.442695, %v361_v47  ;;  %v347_v61 = vmul.f32 %v327_v43, %v327_v43 }
  0x5f   : > { %v1603_v63 = vpop.eup %1602  ;;  %v293_v1 = vmul.f32 %v2084_v32, %v277_v51  ;;  %v220_v4 = vmul.f32 %v200_v52, %v200_v52  ;;  %v201_v5 = vsub.f32 %v2177_v55, %v2043_v23  ;;  %v379_v6 = vmul.f32 1.442695, %v362_v56 }
  0x60   : > { %v1605_v7 = vpop.eup %1604  ;;  %v294_v8 = vmul.f32 %v2084_v32, %v278_v57  ;;  %v279_v9 = vmul.f32 0.039788734, %v1603_v63  ;;  %1610 = vpow2.f32 %v264_v58  ;;  %v363_v13 = vmul.f32 -0.125, %v347_v61 }
  0x61   : > { %309 = vst [vmem:[%s2105_s25 + $0x38] sm:$0xff] %v293_v1  ;;  %v280_v15 = vmul.f32 0.039788734, %v1605_v7  ;;  %v236_v16 = vmul.f32 -0.125, %v220_v4  ;;  %v221_v19 = vmul.f32 %v201_v5, %v201_v5  ;;  %1612 = vpow2.f32 %v377_v60 }
  0x62   : > { %310 = vst [vmem:[%s2105_s25 + $0x40] sm:$0xff] %v294_v8  ;;  %v295_v24 = vmul.f32 %v2084_v32, %v279_v9  ;;  %1614 = vpow2.f32 %v379_v6  ;;  %v381_v27 = vmul.f32 1.442695, %v363_v13  ;;  %v348_v23 = vmul.f32 %v328_v48, %v328_v48 }
  0x63   : > { %v1607_v28 = vpop.eup %1606  ;;  %v296_v29 = vmul.f32 %v2084_v32, %v280_v15  ;;  %v266_v25 = vmul.f32 1.442695, %v236_v16  ;;  %v237_v31 = vmul.f32 -0.125, %v221_v19  ;;  %v329_v26 = vsub.f32 %v2073_v18, %v2158_v22 }
  0x64   : > { %311 = vst [vmem:[%s2105_s25 + $0x48] sm:$0xff] %v295_v24  ;;  %v281_v2 = vmul.f32 0.039788734, %v1607_v28  ;;  %1616 = vpow2.f32 %v381_v27  ;;  %v364_v35 = vmul.f32 -0.125, %v348_v23  ;;  %v330_v10 = vsub.f32 %v2077_v21, %v2158_v22 }
  0x65   : > { %312 = vst [vmem:[%s2105_s25 + $0x50] sm:$0xff] %v296_v29  ;;  %1618 = vpow2.f32 %v266_v25  ;;  %v268_v36 = vmul.f32 1.442695, %v237_v31  ;;  %v349_v41 = vmul.f32 %v329_v26, %v329_v26  ;;  %v331_v42 = vsub.f32 %v2089_v38, %v2158_v22 }
  0x66   : > { %v1609_v43 = vpop.eup %1608  ;;  %v297_v45 = vmul.f32 %v2084_v32, %v281_v2  ;;  %v383_v46 = vmul.f32 1.442695, %v364_v35  ;;  %v350_v47 = vmul.f32 %v330_v10, %v330_v10  ;;  %v332_v48 = vsub.f32 %v2108_v59, %v2158_v22 }
  0x67   : > { %v282_v50 = vmul.f32 0.039788734, %v1609_v43  ;;  %1620 = vpow2.f32 %v268_v36  ;;  %v365_v51 = vmul.f32 -0.125, %v349_v41  ;;  %v351_v52 = vmul.f32 %v331_v42, %v331_v42 }
  0x68   : > { %313 = vst [vmem:[%s2105_s25 + $0x58] sm:$0xff] %v297_v45  ;;  %1622 = vpow2.f32 %v383_v46  ;;  %v366_v56 = vmul.f32 -0.125, %v350_v47  ;;  %v352_v57 = vmul.f32 %v332_v48, %v332_v48  ;;  %v333_v58 = vsub.f32 %v2113_v0, %v2158_v22 }
  0x69   : > { %v298_v60 = vmul.f32 %v2084_v32, %v282_v50  ;;  %v385_v61 = vmul.f32 1.442695, %v365_v51  ;;  %v367_v63 = vmul.f32 -0.125, %v351_v52  ;;  %v334_v1 = vsub.f32 %v2122_v12, %v2158_v22 }
  0x6a   : > { %v1611_v4 = vpop.eup %1610  ;;  %v387_v5 = vmul.f32 1.442695, %v366_v56  ;;  %v368_v6 = vmul.f32 -0.125, %v352_v57  ;;  %v353_v7 = vmul.f32 %v333_v58, %v333_v58  ;;  %v335_v8 = vsub.f32 %v2127_v17, %v2158_v22 }
  0x6b   : > { %v1613_v9 = vpop.eup %1612  ;;  %314 = vst [vmem:[%s2105_s25 + $0x60] sm:$0xff] %v298_v60  ;;  %v283_v13 = vmul.f32 0.039788734, %v1611_v4  ;;  %1624 = vpow2.f32 %v385_v61  ;;  %v389_v15 = vmul.f32 1.442695, %v367_v63  ;;  %v354_v16 = vmul.f32 %v334_v1, %v334_v1 }
  0x6c   : > { %v1615_v19 = vpop.eup %1614  ;;  %v409_v24 = vmul.f32 0.039788734, %v1613_v9  ;;  %1626 = vpow2.f32 %v387_v5  ;;  %v391_v27 = vmul.f32 1.442695, %v368_v6  ;;  %v369_v23 = vmul.f32 -0.125, %v353_v7 }
  0x6d   : > { %v299_v28 = vmul.f32 %v2084_v32, %v283_v13  ;;  %v410_v29 = vmul.f32 0.039788734, %v1615_v19  ;;  %1628 = vpow2.f32 %v389_v15  ;;  %v370_v25 = vmul.f32 -0.125, %v354_v16 }
  0x6e   : > { %v1617_v31 = vpop.eup %1616  ;;  %v425_v26 = vmul.f32 %v2092_v40, %v409_v24  ;;  %1630 = vpow2.f32 %v391_v27  ;;  %v393_v2 = vmul.f32 1.442695, %v369_v23  ;;  %v355_v35 = vmul.f32 %v335_v8, %v335_v8 }
  0x6f   : > { %v1619_v10 = vpop.eup %1618  ;;  %315 = vst [vmem:[%s2105_s25 + $0x68] sm:$0xff] %v299_v28  ;;  %v426_v36 = vmul.f32 %v2092_v40, %v410_v29  ;;  %v411_v41 = vmul.f32 0.039788734, %v1617_v31  ;;  %v395_v42 = vmul.f32 1.442695, %v370_v25  ;;  %v336_v43 = vsub.f32 %v2135_v39, %v2158_v22 }
  0x70   : > { %v284_v45 = vmul.f32 0.039788734, %v1619_v10  ;;  %1398 = vst [vmem:[%s2105_s25 + $0x80] sm:$0xff] %v425_v26  ;;  %1632 = vpow2.f32 %v393_v2  ;;  %v371_v46 = vmul.f32 -0.125, %v355_v35  ;;  %v337_v47 = vsub.f32 %v2145_v53, %v2158_v22 }
  0x71   : > { %v1621_v48 = vpop.eup %1620  ;;  %1399 = vst [vmem:[%s2105_s25 + $0x88] sm:$0xff] %v426_v36  ;;  %v427_v50 = vmul.f32 %v2092_v40, %v411_v41  ;;  %1634 = vpow2.f32 %v395_v42  ;;  %v356_v51 = vmul.f32 %v336_v43, %v336_v43  ;;  %v338_v52 = vsub.f32 %v2153_v11, %v2158_v22 }
  0x72   : > { %v1623_v56 = vpop.eup %1622  ;;  %v300_v57 = vmul.f32 %v2084_v32, %v284_v45  ;;  %v285_v58 = vmul.f32 0.039788734, %v1621_v48  ;;  %v397_v60 = vmul.f32 1.442695, %v371_v46  ;;  %v357_v61 = vmul.f32 %v337_v47, %v337_v47 }
  0x73   : > { %1400 = vst [vmem:[%s2105_s25 + $0x90] sm:$0xff] %v427_v50  ;;  %v412_v63 = vmul.f32 0.039788734, %v1623_v56  ;;  %v372_v1 = vmul.f32 -0.125, %v356_v51  ;;  %v358_v4 = vmul.f32 %v338_v52, %v338_v52  ;;  %v339_v5 = vsub.f32 %v2168_v37, %v2158_v22 }
  0x74   : > { %316 = vst [vmem:[%s2105_s25 + $0x70] sm:$0xff] %v300_v57  ;;  %v301_v6 = vmul.f32 %v2084_v32, %v285_v58  ;;  %1636 = vpow2.f32 %v397_v60  ;;  %v373_v7 = vmul.f32 -0.125, %v357_v61  ;;  %v340_v8 = vsub.f32 %v2177_v55, %v2158_v22 }
  0x75   : > { %v1625_v9 = vpop.eup %1624  ;;  %v428_v13 = vmul.f32 %v2092_v40, %v412_v63  ;;  %v399_v15 = vmul.f32 1.442695, %v372_v1  ;;  %v374_v16 = vmul.f32 -0.125, %v358_v4  ;;  %v359_v19 = vmul.f32 %v339_v5, %v339_v5 }
  0x76   : > { %v1627_v24 = vpop.eup %1626  ;;  %317 = vst [vmem:[%s2105_s25 + $0x78] sm:$0xff] %v301_v6  ;;  %v413_v27 = vmul.f32 0.039788734, %v1625_v9  ;;  %v401_v23 = vmul.f32 1.442695, %v373_v7  ;;  %v360_v28 = vmul.f32 %v340_v8, %v340_v8  ;;  %v2234_v29 = vstv %s2210_s29  ;;  %s1859_s29 = sshll.u32 %s1924_s28, 4  ;;  %s1860_s29 = int_to_ptr.vmem [resolvable:$false] %s1859_s29 }
  0x77   : > { %v1629_v32 = vpop.eup %1628  ;;  %1401 = vst [vmem:[%s2105_s25 + $0x98] sm:$0xff] %v428_v13  ;;  %v414_v25 = vmul.f32 0.039788734, %v1627_v24  ;;  %1638 = vpow2.f32 %v399_v15  ;;  %v403_v31 = vmul.f32 1.442695, %v374_v16  ;;  %v375_v22 = vmul.f32 -0.125, %v359_v19  ;;  %p1862_p12 = scmp.lt.s32.totalorder %s2678_s20, %s1860_s29 }
  0x78   : > { %v1631_v26 = vpop.eup %1630  ;;  %v429_v2 = vmul.f32 %v2092_v40, %v413_v27  ;;  %v415_v35 = vmul.f32 0.039788734, %v1629_v32  ;;  %1640 = vpow2.f32 %v401_v23  ;;  %v376_v10 = vmul.f32 -0.125, %v360_v28  ;;  %s1861_s30 = scalar_lea.vmem %s1860_s29, 32768 }
  0x79   : > { %v430_v36 = vmul.f32 %v2092_v40, %v414_v25  ;;  %v416_v41 = vmul.f32 0.039788734, %v1631_v26  ;;  %1642 = vpow2.f32 %v403_v31  ;;  %v405_v42 = vmul.f32 1.442695, %v375_v22  ;;  %p1863_p13 = scmp.lt.s32.totalorder %s1861_s30, %s1855_s27 }
  0x7a   : > { %v1633_v43 = vpop.eup %1632  ;;  %1402 = vst [vmem:[%s2105_s25 + $0xa0] sm:$0xff] %v429_v2  ;;  %v431_v45 = vmul.f32 %v2092_v40, %v415_v35  ;;  %v407_v46 = vmul.f32 1.442695, %v376_v10  ;;  %v465_v47 = vsub.f32 %v2037_v20, %v2234_v29  ;;  %v466_v48 = vsub.f32 %v2055_v30, %v2234_v29 }
  0x7b   : > { %v1635_v50 = vpop.eup %1634  ;;  %1403 = vst [vmem:[%s2105_s25 + $0xa8] sm:$0xff] %v430_v36  ;;  %v432_v51 = vmul.f32 %v2092_v40, %v416_v41  ;;  %v417_v52 = vmul.f32 0.039788734, %v1633_v43  ;;  %1644 = vpow2.f32 %v405_v42  ;;  %v467_v56 = vsub.f32 %v2058_v33, %v2234_v29  ;;  %p1864_p0 = por %p1863_p13, %p1862_p12 }
  0x7c   : > { %1404 = vst [vmem:[%s2105_s25 + $0xb0] sm:$0xff] %v431_v45  ;;  %v418_v57 = vmul.f32 0.039788734, %v1635_v50  ;;  %1646 = vpow2.f32 %v407_v46  ;;  %v485_v58 = vmul.f32 %v465_v47, %v465_v47  ;;  %v486_v60 = vmul.f32 %v466_v48, %v466_v48 }
  0x7d   : > { %1405 = vst [vmem:[%s2105_s25 + $0xb8] sm:$0xff] %v432_v51  ;;  %v433_v61 = vmul.f32 %v2092_v40, %v417_v52  ;;  %v487_v63 = vmul.f32 %v467_v56, %v467_v56  ;;  %v468_v1 = vsub.f32 %v2060_v34, %v2234_v29  ;;  %v469_v4 = vsub.f32 %v2073_v18, %v2234_v29  ;;  %p1865_p1 = pnand %p1864_p0, %p1858_p11 }
  0x7e   : > { %v1637_v5 = vpop.eup %1636  ;;  %v434_v6 = vmul.f32 %v2092_v40, %v418_v57  ;;  %v501_v7 = vmul.f32 -0.125, %v485_v58  ;;  %v502_v8 = vmul.f32 -0.125, %v486_v60  ;;  %v470_v9 = vsub.f32 %v2077_v21, %v2234_v29 }
  0x7f   : > { %1406 = vst [vmem:[%s2105_s25 + $0xc0] sm:$0xff] %v433_v61  ;;  %v419_v13 = vmul.f32 0.039788734, %v1637_v5  ;;  %v503_v15 = vmul.f32 -0.125, %v487_v63  ;;  %v488_v16 = vmul.f32 %v468_v1, %v468_v1  ;;  %v489_v19 = vmul.f32 %v469_v4, %v469_v4 }
  0x80   : > { %1407 = vst [vmem:[%s2105_s25 + $0xc8] sm:$0xff] %v434_v6  ;;  %v517_v24 = vmul.f32 1.442695, %v501_v7  ;;  %v519_v27 = vmul.f32 1.442695, %v502_v8  ;;  %v490_v23 = vmul.f32 %v470_v9, %v470_v9  ;;  %v471_v28 = vsub.f32 %v2089_v38, %v2234_v29 }
  0x81   : > { %v1639_v32 = vpop.eup %1638  ;;  %v435_v25 = vmul.f32 %v2092_v40, %v419_v13  ;;  %v521_v31 = vmul.f32 1.442695, %v503_v15  ;;  %v504_v22 = vmul.f32 -0.125, %v488_v16  ;;  %v505_v26 = vmul.f32 -0.125, %v489_v19 }
  0x82   : > { %v1641_v2 = vpop.eup %1640  ;;  %v420_v35 = vmul.f32 0.039788734, %v1639_v32  ;;  %1648 = vpow2.f32 %v517_v24  ;;  %v506_v10 = vmul.f32 -0.125, %v490_v23  ;;  %v491_v36 = vmul.f32 %v471_v28, %v471_v28 }
  0x83   : > { %v1643_v41 = vpop.eup %1642  ;;  %1408 = vst [vmem:[%s2105_s25 + $0xd0] sm:$0xff] %v435_v25  ;;  %v421_v42 = vmul.f32 0.039788734, %v1641_v2  ;;  %1650 = vpow2.f32 %v519_v27  ;;  %v523_v43 = vmul.f32 1.442695, %v504_v22  ;;  %v472_v56 = vsub.f32 %v2108_v59, %v2234_v29 }
  0x84   : > { %v525_v45 = vmul.f32 1.442695, %v505_v26  ;;  %v436_v46 = vmul.f32 %v2092_v40, %v420_v35  ;;  %v422_v47 = vmul.f32 0.039788734, %v1643_v41  ;;  %1652 = vpow2.f32 %v521_v31 }
  0x85   : > { %v527_v48 = vmul.f32 1.442695, %v506_v10  ;;  %v1645_v50 = vpop.eup %1644  ;;  %v437_v51 = vmul.f32 %v2092_v40, %v421_v42  ;;  %1654 = vpow2.f32 %v523_v43  ;;  %v507_v52 = vmul.f32 -0.125, %v491_v36 }
  0x86   : > { %v1647_v57 = vpop.eup %1646  ;;  %1409 = vst [vmem:[%s2105_s25 + $0xd8] sm:$0xff] %v436_v46  ;;  %v438_v58 = vmul.f32 %v2092_v40, %v422_v47  ;;  %v423_v60 = vmul.f32 0.039788734, %v1645_v50  ;;  %1656 = vpow2.f32 %v525_v45  ;;  %v473_v61 = vsub.f32 %v2113_v0, %v2234_v29 }
  0x87   : > { %1410 = vst [vmem:[%s2105_s25 + $0xe0] sm:$0xff] %v437_v51  ;;  %v424_v63 = vmul.f32 0.039788734, %v1647_v57  ;;  %1658 = vpow2.f32 %v527_v48  ;;  %v529_v1 = vmul.f32 1.442695, %v507_v52  ;;  %v492_v4 = vmul.f32 %v472_v56, %v472_v56 }
  0x88   : > { %1411 = vst [vmem:[%s2105_s25 + $0xe8] sm:$0xff] %v438_v58  ;;  %v439_v5 = vmul.f32 %v2092_v40, %v423_v60  ;;  %v493_v6 = vmul.f32 %v473_v61, %v473_v61  ;;  %v474_v7 = vsub.f32 %v2122_v12, %v2234_v29  ;;  %v475_v8 = vsub.f32 %v2127_v17, %v2234_v29 }
  0x89   : > { %v440_v9 = vmul.f32 %v2092_v40, %v424_v63  ;;  %1660 = vpow2.f32 %v529_v1  ;;  %v508_v13 = vmul.f32 -0.125, %v492_v4  ;;  %v476_v15 = vsub.f32 %v2135_v39, %v2234_v29 }
  0x8a   : > { %1412 = vst [vmem:[%s2105_s25 + $0xf0] sm:$0xff] %v439_v5  ;;  %v509_v16 = vmul.f32 -0.125, %v493_v6  ;;  %v494_v19 = vmul.f32 %v474_v7, %v474_v7  ;;  %v495_v24 = vmul.f32 %v475_v8, %v475_v8  ;;  %v477_v27 = vsub.f32 %v2145_v53, %v2234_v29 }
  0x8b   : > { %1413 = vst [vmem:[%s2105_s25 + $0xf8] sm:$0xff] %v440_v9  ;;  %v531_v23 = vmul.f32 1.442695, %v508_v13  ;;  %v496_v28 = vmul.f32 %v476_v15, %v476_v15  ;;  %v478_v32 = vsub.f32 %v2153_v11, %v2234_v29  ;;  %v479_v40 = vsub.f32 %v2168_v37, %v2234_v29 }
  0x8c   : > { %v1649_v25 = vpop.eup %1648  ;;  %v533_v31 = vmul.f32 1.442695, %v509_v16  ;;  %v510_v22 = vmul.f32 -0.125, %v494_v19  ;;  %v511_v26 = vmul.f32 -0.125, %v495_v24  ;;  %v497_v2 = vmul.f32 %v477_v27, %v477_v27 }
  0x8d   : > { %v1651_v35 = vpop.eup %1650  ;;  %v549_v10 = vmul.f32 0.039788734, %v1649_v25  ;;  %1662 = vpow2.f32 %v531_v23  ;;  %v512_v36 = vmul.f32 -0.125, %v496_v28  ;;  %v498_v41 = vmul.f32 %v478_v32, %v478_v32 }
  0x8e   : > { %v1653_v42 = vpop.eup %1652  ;;  %v550_v43 = vmul.f32 0.039788734, %v1651_v35  ;;  %1664 = vpow2.f32 %v533_v31  ;;  %v535_v45 = vmul.f32 1.442695, %v510_v22  ;;  %v537_v46 = vmul.f32 1.442695, %v511_v26 }
  0x8f   : > { %v1655_v47 = vpop.eup %1654  ;;  %v565_v48 = vmul.f32 %v2094_v44, %v549_v10  ;;  %v551_v50 = vmul.f32 0.039788734, %v1653_v42  ;;  %v539_v51 = vmul.f32 1.442695, %v512_v36  ;;  %v513_v52 = vmul.f32 -0.125, %v497_v2 }
  0x90   : > { %v1657_v56 = vpop.eup %1656  ;;  %v566_v57 = vmul.f32 %v2094_v44, %v550_v43  ;;  %v552_v58 = vmul.f32 0.039788734, %v1655_v47  ;;  %1666 = vpow2.f32 %v535_v45  ;;  %v514_v60 = vmul.f32 -0.125, %v498_v41 }
  0x91   : > { %v1659_v61 = vpop.eup %1658  ;;  %1414 = vst [vmem:[%s2105_s25 + $0x100] sm:$0xff] %v565_v48  ;;  %v567_v63 = vmul.f32 %v2094_v44, %v551_v50  ;;  %v553_v1 = vmul.f32 0.039788734, %v1657_v56  ;;  %1668 = vpow2.f32 %v537_v46  ;;  %v541_v4 = vmul.f32 1.442695, %v513_v52 }
  0x92   : > { %1415 = vst [vmem:[%s2105_s25 + $0x108] sm:$0xff] %v566_v57  ;;  %v568_v5 = vmul.f32 %v2094_v44, %v552_v58  ;;  %v554_v6 = vmul.f32 0.039788734, %v1659_v61  ;;  %1670 = vpow2.f32 %v539_v51  ;;  %v543_v7 = vmul.f32 1.442695, %v514_v60 }
  0x93   : > { %v1661_v8 = vpop.eup %1660  ;;  %1416 = vst [vmem:[%s2105_s25 + $0x110] sm:$0xff] %v567_v63  ;;  %v569_v9 = vmul.f32 %v2094_v44, %v553_v1  ;;  %1672 = vpow2.f32 %v541_v4  ;;  %v499_v13 = vmul.f32 %v479_v40, %v479_v40  ;;  %v480_v15 = vsub.f32 %v2177_v55, %v2234_v29 }
  0x94   : > { %1417 = vst [vmem:[%s2105_s25 + $0x118] sm:$0xff] %v568_v5  ;;  %v570_v16 = vmul.f32 %v2094_v44, %v554_v6  ;;  %v555_v19 = vmul.f32 0.039788734, %v1661_v8  ;;  %1674 = vpow2.f32 %v543_v7  ;;  %v2307_v24 = vstv %s2292_s2 }
  0x95   : > { %1418 = vst [vmem:[%s2105_s25 + $0x120] sm:$0xff] %v569_v9  ;;  %v515_v27 = vmul.f32 -0.125, %v499_v13  ;;  %v500_v23 = vmul.f32 %v480_v15, %v480_v15  ;;  %v605_v28 = vsub.f32 %v2037_v20, %v2307_v24  ;;  %v606_v32 = vsub.f32 %v2055_v30, %v2307_v24 }
  0x96   : > { %1419 = vst [vmem:[%s2105_s25 + $0x128] sm:$0xff] %v570_v16  ;;  %v571_v29 = vmul.f32 %v2094_v44, %v555_v19  ;;  %v607_v40 = vsub.f32 %v2058_v33, %v2307_v24  ;;  %v608_v25 = vsub.f32 %v2060_v34, %v2307_v24  ;;  %v609_v31 = vsub.f32 %v2073_v18, %v2307_v24 }
  0x97   : > { %v1663_v22 = vpop.eup %1662  ;;  %v545_v26 = vmul.f32 1.442695, %v515_v27  ;;  %v516_v2 = vmul.f32 -0.125, %v500_v23  ;;  %v625_v35 = vmul.f32 %v605_v28, %v605_v28  ;;  %v626_v10 = vmul.f32 %v606_v32, %v606_v32 }
  0x98   : > { %v1665_v36 = vpop.eup %1664  ;;  %1420 = vst [vmem:[%s2105_s25 + $0x130] sm:$0xff] %v571_v29  ;;  %v556_v41 = vmul.f32 0.039788734, %v1663_v22  ;;  %v627_v42 = vmul.f32 %v607_v40, %v607_v40  ;;  %v628_v43 = vmul.f32 %v608_v25, %v608_v25  ;;  %v629_v45 = vmul.f32 %v609_v31, %v609_v31 }
  0x99   : > { %v557_v46 = vmul.f32 0.039788734, %v1665_v36  ;;  %1676 = vpow2.f32 %v545_v26  ;;  %v547_v47 = vmul.f32 1.442695, %v516_v2  ;;  %v641_v48 = vmul.f32 -0.125, %v625_v35 }
  0x9a   : > { %v1667_v50 = vpop.eup %1666  ;;  %v572_v51 = vmul.f32 %v2094_v44, %v556_v41  ;;  %v642_v52 = vmul.f32 -0.125, %v626_v10  ;;  %v643_v56 = vmul.f32 -0.125, %v627_v42  ;;  %v644_v57 = vmul.f32 -0.125, %v628_v43 }
  0x9b   : > { %v1669_v58 = vpop.eup %1668  ;;  %v573_v60 = vmul.f32 %v2094_v44, %v557_v46  ;;  %v558_v61 = vmul.f32 0.039788734, %v1667_v50  ;;  %1678 = vpow2.f32 %v547_v47  ;;  %v657_v63 = vmul.f32 1.442695, %v641_v48 }
  0x9c   : > { %v1671_v1 = vpop.eup %1670  ;;  %1421 = vst [vmem:[%s2105_s25 + $0x138] sm:$0xff] %v572_v51  ;;  %v559_v4 = vmul.f32 0.039788734, %v1669_v58  ;;  %v659_v5 = vmul.f32 1.442695, %v642_v52  ;;  %v610_v7 = vsub.f32 %v2077_v21, %v2307_v24  ;;  %v645_v23 = vmul.f32 -0.125, %v629_v45 }
  0x9d   : > { %v661_v6 = vmul.f32 1.442695, %v643_v56  ;;  %v1673_v8 = vpop.eup %1672  ;;  %1422 = vst [vmem:[%s2105_s25 + $0x140] sm:$0xff] %v573_v60  ;;  %v574_v9 = vmul.f32 %v2094_v44, %v558_v61  ;;  %v560_v13 = vmul.f32 0.039788734, %v1671_v1  ;;  %1680 = vpow2.f32 %v657_v63 }
  0x9e   : > { %v663_v15 = vmul.f32 1.442695, %v644_v57  ;;  %v1675_v16 = vpop.eup %1674  ;;  %v575_v19 = vmul.f32 %v2094_v44, %v559_v4  ;;  %v561_v27 = vmul.f32 0.039788734, %v1673_v8  ;;  %1682 = vpow2.f32 %v659_v5 }
  0x9f   : > { %1423 = vst [vmem:[%s2105_s25 + $0x148] sm:$0xff] %v574_v9  ;;  %v576_v28 = vmul.f32 %v2094_v44, %v560_v13  ;;  %v562_v32 = vmul.f32 0.039788734, %v1675_v16  ;;  %1684 = vpow2.f32 %v661_v6  ;;  %v630_v29 = vmul.f32 %v610_v7, %v610_v7 }
  0xa0   : > { %1424 = vst [vmem:[%s2105_s25 + $0x150] sm:$0xff] %v575_v19  ;;  %v577_v40 = vmul.f32 %v2094_v44, %v561_v27  ;;  %1686 = vpow2.f32 %v663_v15  ;;  %v665_v25 = vmul.f32 1.442695, %v645_v23  ;;  %v611_v31 = vsub.f32 %v2089_v38, %v2307_v24 }
  0xa1   : > { %1425 = vst [vmem:[%s2105_s25 + $0x158] sm:$0xff] %v576_v28  ;;  %v578_v22 = vmul.f32 %v2094_v44, %v562_v32  ;;  %v646_v26 = vmul.f32 -0.125, %v630_v29  ;;  %v612_v2 = vsub.f32 %v2108_v59, %v2307_v24  ;;  %v613_v35 = vsub.f32 %v2113_v0, %v2307_v24 }
  0xa2   : > { %1426 = vst [vmem:[%s2105_s25 + $0x160] sm:$0xff] %v577_v40  ;;  %1688 = vpow2.f32 %v665_v25  ;;  %v631_v10 = vmul.f32 %v611_v31, %v611_v31  ;;  %v614_v36 = vsub.f32 %v2122_v12, %v2307_v24  ;;  %v615_v41 = vsub.f32 %v2127_v17, %v2307_v24 }
  0xa3   : > { %v1677_v42 = vpop.eup %1676  ;;  %1427 = vst [vmem:[%s2105_s25 + $0x168] sm:$0xff] %v578_v22  ;;  %v667_v43 = vmul.f32 1.442695, %v646_v26  ;;  %v632_v45 = vmul.f32 %v612_v2, %v612_v2  ;;  %v633_v46 = vmul.f32 %v613_v35, %v613_v35  ;;  %v616_v47 = vsub.f32 %v2135_v39, %v2307_v24 }
  0xa4   : > { %v563_v48 = vmul.f32 0.039788734, %v1677_v42  ;;  %v647_v50 = vmul.f32 -0.125, %v631_v10  ;;  %v634_v51 = vmul.f32 %v614_v36, %v614_v36  ;;  %v635_v52 = vmul.f32 %v615_v41, %v615_v41 }
  0xa5   : > { %v1679_v56 = vpop.eup %1678  ;;  %1690 = vpow2.f32 %v667_v43  ;;  %v648_v57 = vmul.f32 -0.125, %v632_v45  ;;  %v649_v58 = vmul.f32 -0.125, %v633_v46  ;;  %v636_v60 = vmul.f32 %v616_v47, %v616_v47 }
  0xa6   : > { %v579_v61 = vmul.f32 %v2094_v44, %v563_v48  ;;  %v564_v63 = vmul.f32 0.039788734, %v1679_v56  ;;  %v669_v1 = vmul.f32 1.442695, %v647_v50  ;;  %v650_v4 = vmul.f32 -0.125, %v634_v51 }
  0xa7   : > { %v1681_v5 = vpop.eup %1680  ;;  %v671_v6 = vmul.f32 1.442695, %v648_v57  ;;  %v673_v7 = vmul.f32 1.442695, %v649_v58  ;;  %v651_v8 = vmul.f32 -0.125, %v635_v52  ;;  %v652_v9 = vmul.f32 -0.125, %v636_v60 }
  0xa8   : > { %v1683_v13 = vpop.eup %1682  ;;  %1428 = vst [vmem:[%s2105_s25 + $0x170] sm:$0xff] %v579_v61  ;;  %v580_v15 = vmul.f32 %v2094_v44, %v564_v63  ;;  %v689_v16 = vmul.f32 0.039788734, %v1681_v5  ;;  %1692 = vpow2.f32 %v669_v1  ;;  %v675_v19 = vmul.f32 1.442695, %v650_v4 }
  0xa9   : > { %v1685_v27 = vpop.eup %1684  ;;  %v690_v23 = vmul.f32 0.039788734, %v1683_v13  ;;  %1694 = vpow2.f32 %v671_v6  ;;  %v677_v28 = vmul.f32 1.442695, %v651_v8  ;;  %v679_v32 = vmul.f32 1.442695, %v652_v9 }
  0xaa   : > { %v1687_v29 = vpop.eup %1686  ;;  %1429 = vst [vmem:[%s2105_s25 + $0x178] sm:$0xff] %v580_v15  ;;  %v705_v40 = vmul.f32 %v2099_v49, %v689_v16  ;;  %v691_v25 = vmul.f32 0.039788734, %v1685_v27  ;;  %1696 = vpow2.f32 %v673_v7  ;;  %v617_v31 = vsub.f32 %v2145_v53, %v2307_v24 }
  0xab   : > { %v706_v44 = vmul.f32 %v2099_v49, %v690_v23  ;;  %v692_v22 = vmul.f32 0.039788734, %v1687_v29  ;;  %1698 = vpow2.f32 %v675_v19  ;;  %v618_v26 = vsub.f32 %v2153_v11, %v2307_v24 }
  0xac   : > { %v1689_v2 = vpop.eup %1688  ;;  %1430 = vst [vmem:[%s2105_s25 + $0x180] sm:$0xff] %v705_v40  ;;  %v707_v35 = vmul.f32 %v2099_v49, %v691_v25  ;;  %1700 = vpow2.f32 %v677_v28  ;;  %v637_v10 = vmul.f32 %v617_v31, %v617_v31  ;;  %v619_v36 = vsub.f32 %v2168_v37, %v2307_v24 }
  0xad   : > { %1431 = vst [vmem:[%s2105_s25 + $0x188] sm:$0xff] %v706_v44  ;;  %v708_v41 = vmul.f32 %v2099_v49, %v692_v22  ;;  %v693_v42 = vmul.f32 0.039788734, %v1689_v2  ;;  %1702 = vpow2.f32 %v679_v32  ;;  %v638_v43 = vmul.f32 %v618_v26, %v618_v26 }
  0xae   : > { %1432 = vst [vmem:[%s2105_s25 + $0x190] sm:$0xff] %v707_v35  ;;  %v653_v45 = vmul.f32 -0.125, %v637_v10  ;;  %v639_v46 = vmul.f32 %v619_v36, %v619_v36  ;;  %v620_v47 = vsub.f32 %v2177_v55, %v2307_v24  ;;  %v2374_v48 = vstv %s2353_s4 }
  0xaf   : > { %v1691_v50 = vpop.eup %1690  ;;  %1433 = vst [vmem:[%s2105_s25 + $0x198] sm:$0xff] %v708_v41  ;;  %v709_v51 = vmul.f32 %v2099_v49, %v693_v42  ;;  %v654_v52 = vmul.f32 -0.125, %v638_v43  ;;  %v745_v56 = vsub.f32 %v2037_v20, %v2374_v48  ;;  %v746_v57 = vsub.f32 %v2055_v30, %v2374_v48 }
  0xb0   : > { %v694_v58 = vmul.f32 0.039788734, %v1691_v50  ;;  %v681_v60 = vmul.f32 1.442695, %v653_v45  ;;  %v655_v61 = vmul.f32 -0.125, %v639_v46  ;;  %v640_v63 = vmul.f32 %v620_v47, %v620_v47 }
  0xb1   : > { %1434 = vst [vmem:[%s2105_s25 + $0x1a0] sm:$0xff] %v709_v51  ;;  %v683_v24 = vmul.f32 1.442695, %v654_v52  ;;  %v765_v1 = vmul.f32 %v745_v56, %v745_v56  ;;  %v766_v4 = vmul.f32 %v746_v57, %v746_v57  ;;  %v747_v5 = vsub.f32 %v2058_v33, %v2374_v48 }
  0xb2   : > { %v1693_v6 = vpop.eup %1692  ;;  %v710_v7 = vmul.f32 %v2099_v49, %v694_v58  ;;  %1704 = vpow2.f32 %v681_v60  ;;  %v685_v8 = vmul.f32 1.442695, %v655_v61  ;;  %v656_v9 = vmul.f32 -0.125, %v640_v63 }
  0xb3   : > { %v1695_v13 = vpop.eup %1694  ;;  %v695_v15 = vmul.f32 0.039788734, %v1693_v6  ;;  %1706 = vpow2.f32 %v683_v24  ;;  %v781_v16 = vmul.f32 -0.125, %v765_v1  ;;  %v782_v19 = vmul.f32 -0.125, %v766_v4 }
  0xb4   : > { %v1697_v27 = vpop.eup %1696  ;;  %1435 = vst [vmem:[%s2105_s25 + $0x1a8] sm:$0xff] %v710_v7  ;;  %v696_v23 = vmul.f32 0.039788734, %v1695_v13  ;;  %1708 = vpow2.f32 %v685_v8  ;;  %v687_v28 = vmul.f32 1.442695, %v656_v9  ;;  %v767_v32 = vmul.f32 %v747_v5, %v747_v5 }
  0xb5   : > { %v1699_v29 = vpop.eup %1698  ;;  %v711_v40 = vmul.f32 %v2099_v49, %v695_v15  ;;  %v697_v25 = vmul.f32 0.039788734, %v1697_v27  ;;  %v797_v31 = vmul.f32 1.442695, %v781_v16  ;;  %v799_v44 = vmul.f32 1.442695, %v782_v19 }
  0xb6   : > { %v1701_v22 = vpop.eup %1700  ;;  %v712_v26 = vmul.f32 %v2099_v49, %v696_v23  ;;  %v698_v2 = vmul.f32 0.039788734, %v1699_v29  ;;  %1710 = vpow2.f32 %v687_v28  ;;  %v783_v35 = vmul.f32 -0.125, %v767_v32 }
  0xb7   : > { %v1703_v10 = vpop.eup %1702  ;;  %1436 = vst [vmem:[%s2105_s25 + $0x1b0] sm:$0xff] %v711_v40  ;;  %v713_v36 = vmul.f32 %v2099_v49, %v697_v25  ;;  %v699_v41 = vmul.f32 0.039788734, %v1701_v22  ;;  %1712 = vpow2.f32 %v797_v31  ;;  %v748_v42 = vsub.f32 %v2060_v34, %v2374_v48 }
  0xb8   : > { %1437 = vst [vmem:[%s2105_s25 + $0x1b8] sm:$0xff] %v712_v26  ;;  %v714_v43 = vmul.f32 %v2099_v49, %v698_v2  ;;  %v700_v45 = vmul.f32 0.039788734, %v1703_v10  ;;  %1714 = vpow2.f32 %v799_v44  ;;  %v801_v46 = vmul.f32 1.442695, %v783_v35 }
  0xb9   : > { %1438 = vst [vmem:[%s2105_s25 + $0x1c0] sm:$0xff] %v713_v36  ;;  %v715_v47 = vmul.f32 %v2099_v49, %v699_v41  ;;  %v768_v50 = vmul.f32 %v748_v42, %v748_v42  ;;  %v749_v51 = vsub.f32 %v2073_v18, %v2374_v48  ;;  %v750_v52 = vsub.f32 %v2077_v21, %v2374_v48 }
  0xba   : > { %1439 = vst [vmem:[%s2105_s25 + $0x1c8] sm:$0xff] %v714_v43  ;;  %v716_v56 = vmul.f32 %v2099_v49, %v700_v45  ;;  %1716 = vpow2.f32 %v801_v46  ;;  %v751_v57 = vsub.f32 %v2089_v38, %v2374_v48  ;;  %v752_v58 = vsub.f32 %v2108_v59, %v2374_v48 }
  0xbb   : > { %1440 = vst [vmem:[%s2105_s25 + $0x1d0] sm:$0xff] %v715_v47  ;;  %v784_v60 = vmul.f32 -0.125, %v768_v50  ;;  %v769_v61 = vmul.f32 %v749_v51, %v749_v51  ;;  %v770_v63 = vmul.f32 %v750_v52, %v750_v52  ;;  %v753_v24 = vsub.f32 %v2113_v0, %v2374_v48 }
  0xbc   : > { %v1705_v1 = vpop.eup %1704  ;;  %1441 = vst [vmem:[%s2105_s25 + $0x1d8] sm:$0xff] %v716_v56  ;;  %v771_v4 = vmul.f32 %v751_v57, %v751_v57  ;;  %v772_v5 = vmul.f32 %v752_v58, %v752_v58  ;;  %v754_v6 = vsub.f32 %v2122_v12, %v2374_v48  ;;  %v755_v7 = vsub.f32 %v2127_v17, %v2374_v48 }
  0xbd   : > { %v1707_v8 = vpop.eup %1706  ;;  %v701_v9 = vmul.f32 0.039788734, %v1705_v1  ;;  %v803_v13 = vmul.f32 1.442695, %v784_v60  ;;  %v785_v15 = vmul.f32 -0.125, %v769_v61  ;;  %v786_v16 = vmul.f32 -0.125, %v770_v63 }
  0xbe   : > { %v1709_v19 = vpop.eup %1708  ;;  %v702_v27 = vmul.f32 0.039788734, %v1707_v8  ;;  %v787_v23 = vmul.f32 -0.125, %v771_v4  ;;  %v788_v28 = vmul.f32 -0.125, %v772_v5  ;;  %v773_v32 = vmul.f32 %v753_v24, %v753_v24 }
  0xbf   : > { %v717_v29 = vmul.f32 %v2099_v49, %v701_v9  ;;  %v703_v40 = vmul.f32 0.039788734, %v1709_v19  ;;  %1718 = vpow2.f32 %v803_v13  ;;  %v805_v25 = vmul.f32 1.442695, %v785_v15 }
  0xc0   : > { %v1711_v31 = vpop.eup %1710  ;;  %v718_v44 = vmul.f32 %v2099_v49, %v702_v27  ;;  %v807_v22 = vmul.f32 1.442695, %v786_v16  ;;  %v809_v26 = vmul.f32 1.442695, %v787_v23  ;;  %v811_v2 = vmul.f32 1.442695, %v788_v28 }
  0xc1   : > { %v1713_v35 = vpop.eup %1712  ;;  %1442 = vst [vmem:[%s2105_s25 + $0x1e0] sm:$0xff] %v717_v29  ;;  %v719_v10 = vmul.f32 %v2099_v49, %v703_v40  ;;  %v704_v36 = vmul.f32 0.039788734, %v1711_v31  ;;  %1720 = vpow2.f32 %v805_v25  ;;  %v789_v41 = vmul.f32 -0.125, %v773_v32 }
  0xc2   : > { %v1715_v42 = vpop.eup %1714  ;;  %1443 = vst [vmem:[%s2105_s25 + $0x1e8] sm:$0xff] %v718_v44  ;;  %v829_v43 = vmul.f32 0.039788734, %v1713_v35  ;;  %1722 = vpow2.f32 %v807_v22  ;;  %v774_v45 = vmul.f32 %v754_v6, %v754_v6  ;;  %v775_v46 = vmul.f32 %v755_v7, %v755_v7 }
  0xc3   : > { %1444 = vst [vmem:[%s2105_s25 + $0x1f0] sm:$0xff] %v719_v10  ;;  %v720_v47 = vmul.f32 %v2099_v49, %v704_v36  ;;  %v830_v50 = vmul.f32 0.039788734, %v1715_v42  ;;  %1724 = vpow2.f32 %v809_v26  ;;  %v813_v51 = vmul.f32 1.442695, %v789_v41 }
  0xc4   : > { %v1717_v52 = vpop.eup %1716  ;;  %v845_v56 = vmul.f32 %v2103_v54, %v829_v43  ;;  %1726 = vpow2.f32 %v811_v2  ;;  %v790_v57 = vmul.f32 -0.125, %v774_v45  ;;  %v791_v58 = vmul.f32 -0.125, %v775_v46 }
  0xc5   : > { %1445 = vst [vmem:[%s2105_s25 + $0x1f8] sm:$0xff] %v720_v47  ;;  %v846_v60 = vmul.f32 %v2103_v54, %v830_v50  ;;  %v831_v61 = vmul.f32 0.039788734, %v1717_v52  ;;  %1728 = vpow2.f32 %v813_v51  ;;  %v756_v63 = vsub.f32 %v2135_v39, %v2374_v48 }
  0xc6   : > { %1446 = vst [vmem:[%s2105_s25 + $0x200] sm:$0xff] %v845_v56  ;;  %v815_v49 = vmul.f32 1.442695, %v790_v57  ;;  %v817_v24 = vmul.f32 1.442695, %v791_v58  ;;  %v757_v1 = vsub.f32 %v2145_v53, %v2374_v48  ;;  %v758_v4 = vsub.f32 %v2153_v11, %v2374_v48 }
  0xc7   : > { %1447 = vst [vmem:[%s2105_s25 + $0x208] sm:$0xff] %v846_v60  ;;  %v847_v5 = vmul.f32 %v2103_v54, %v831_v61  ;;  %v776_v6 = vmul.f32 %v756_v63, %v756_v63  ;;  %v759_v7 = vsub.f32 %v2168_v37, %v2374_v48  ;;  %v760_v8 = vsub.f32 %v2177_v55, %v2374_v48 }
  0xc8   : > { %1730 = vpow2.f32 %v815_v49  ;;  %v777_v9 = vmul.f32 %v757_v1, %v757_v1  ;;  %v778_v13 = vmul.f32 %v758_v4, %v758_v4  ;;  %v2442_v15 = vstv %s2417_s11 }
  0xc9   : > { %v1719_v16 = vpop.eup %1718  ;;  %1448 = vst [vmem:[%s2105_s25 + $0x210] sm:$0xff] %v847_v5  ;;  %1732 = vpow2.f32 %v817_v24  ;;  %v792_v19 = vmul.f32 -0.125, %v776_v6  ;;  %v779_v27 = vmul.f32 %v759_v7, %v759_v7  ;;  %v780_v23 = vmul.f32 %v760_v8, %v760_v8 }
  0xca   : > { %v832_v28 = vmul.f32 0.039788734, %v1719_v16  ;;  %v793_v32 = vmul.f32 -0.125, %v777_v9  ;;  %v794_v29 = vmul.f32 -0.125, %v778_v13  ;;  %v885_v40 = vsub.f32 %v2037_v20, %v2442_v15 }
  0xcb   : > { %v1721_v25 = vpop.eup %1720  ;;  %v819_v48 = vmul.f32 1.442695, %v792_v19  ;;  %v795_v31 = vmul.f32 -0.125, %v779_v27  ;;  %v796_v44 = vmul.f32 -0.125, %v780_v23  ;;  %v886_v22 = vsub.f32 %v2055_v30, %v2442_v15 }
  0xcc   : > { %v1723_v26 = vpop.eup %1722  ;;  %v848_v2 = vmul.f32 %v2103_v54, %v832_v28  ;;  %v833_v35 = vmul.f32 0.039788734, %v1721_v25  ;;  %v821_v10 = vmul.f32 1.442695, %v793_v32  ;;  %v823_v36 = vmul.f32 1.442695, %v794_v29 }
  0xcd   : > { %v1725_v41 = vpop.eup %1724  ;;  %v834_v42 = vmul.f32 0.039788734, %v1723_v26  ;;  %1734 = vpow2.f32 %v819_v48  ;;  %v825_v43 = vmul.f32 1.442695, %v795_v31  ;;  %v827_v45 = vmul.f32 1.442695, %v796_v44 }
  0xce   : > { %v1727_v46 = vpop.eup %1726  ;;  %1449 = vst [vmem:[%s2105_s25 + $0x218] sm:$0xff] %v848_v2  ;;  %v849_v47 = vmul.f32 %v2103_v54, %v833_v35  ;;  %v835_v50 = vmul.f32 0.039788734, %v1725_v41  ;;  %1736 = vpow2.f32 %v821_v10  ;;  %v905_v51 = vmul.f32 %v885_v40, %v885_v40 }
  0xcf   : > { %v1729_v52 = vpop.eup %1728  ;;  %v850_v56 = vmul.f32 %v2103_v54, %v834_v42  ;;  %v836_v57 = vmul.f32 0.039788734, %v1727_v46  ;;  %1738 = vpow2.f32 %v823_v36  ;;  %v906_v58 = vmul.f32 %v886_v22, %v886_v22 }
  0xd0   : > { %1450 = vst [vmem:[%s2105_s25 + $0x220] sm:$0xff] %v849_v47  ;;  %v851_v60 = vmul.f32 %v2103_v54, %v835_v50  ;;  %v837_v61 = vmul.f32 0.039788734, %v1729_v52  ;;  %1740 = vpow2.f32 %v825_v43  ;;  %v921_v63 = vmul.f32 -0.125, %v905_v51 }
  0xd1   : > { %1451 = vst [vmem:[%s2105_s25 + $0x228] sm:$0xff] %v850_v56  ;;  %v852_v49 = vmul.f32 %v2103_v54, %v836_v57  ;;  %1742 = vpow2.f32 %v827_v45  ;;  %v922_v24 = vmul.f32 -0.125, %v906_v58  ;;  %v887_v1 = vsub.f32 %v2058_v33, %v2442_v15 }
  0xd2   : > { %v1731_v4 = vpop.eup %1730  ;;  %1452 = vst [vmem:[%s2105_s25 + $0x230] sm:$0xff] %v851_v60  ;;  %v853_v5 = vmul.f32 %v2103_v54, %v837_v61  ;;  %v937_v6 = vmul.f32 1.442695, %v921_v63  ;;  %v888_v7 = vsub.f32 %v2060_v34, %v2442_v15  ;;  %v889_v8 = vsub.f32 %v2073_v18, %v2442_v15 }
  0xd3   : > { %v1733_v9 = vpop.eup %1732  ;;  %1453 = vst [vmem:[%s2105_s25 + $0x238] sm:$0xff] %v852_v49  ;;  %v838_v13 = vmul.f32 0.039788734, %v1731_v4  ;;  %v939_v16 = vmul.f32 1.442695, %v922_v24  ;;  %v907_v19 = vmul.f32 %v887_v1, %v887_v1  ;;  %v890_v27 = vsub.f32 %v2077_v21, %v2442_v15 }
  0xd4   : > { %1454 = vst [vmem:[%s2105_s25 + $0x240] sm:$0xff] %v853_v5  ;;  %v839_v23 = vmul.f32 0.039788734, %v1733_v9  ;;  %1744 = vpow2.f32 %v937_v6  ;;  %v908_v28 = vmul.f32 %v888_v7, %v888_v7  ;;  %v909_v32 = vmul.f32 %v889_v8, %v889_v8 }
  0xd5   : > { %v854_v29 = vmul.f32 %v2103_v54, %v838_v13  ;;  %1746 = vpow2.f32 %v939_v16  ;;  %v923_v40 = vmul.f32 -0.125, %v907_v19  ;;  %v910_v25 = vmul.f32 %v890_v27, %v890_v27 }
  0xd6   : > { %v855_v48 = vmul.f32 %v2103_v54, %v839_v23  ;;  %v924_v31 = vmul.f32 -0.125, %v908_v28  ;;  %v925_v44 = vmul.f32 -0.125, %v909_v32  ;;  %v891_v22 = vsub.f32 %v2089_v38, %v2442_v15 }
  0xd7   : > { %v1735_v26 = vpop.eup %1734  ;;  %1455 = vst [vmem:[%s2105_s25 + $0x248] sm:$0xff] %v854_v29  ;;  %v941_v2 = vmul.f32 1.442695, %v923_v40  ;;  %v926_v35 = vmul.f32 -0.125, %v910_v25  ;;  %v892_v10 = vsub.f32 %v2108_v59, %v2442_v15  ;;  %v893_v36 = vsub.f32 %v2113_v0, %v2442_v15 }
  0xd8   : > { %v1737_v41 = vpop.eup %1736  ;;  %1456 = vst [vmem:[%s2105_s25 + $0x250] sm:$0xff] %v855_v48  ;;  %v840_v42 = vmul.f32 0.039788734, %v1735_v26  ;;  %v943_v43 = vmul.f32 1.442695, %v924_v31  ;;  %v911_v46 = vmul.f32 %v891_v22, %v891_v22  ;;  %v894_v9 = vsub.f32 %v2122_v12, %v2442_v15 }
  0xd9   : > { %v945_v45 = vmul.f32 1.442695, %v925_v44  ;;  %v1739_v47 = vpop.eup %1738  ;;  %v841_v50 = vmul.f32 0.039788734, %v1737_v41  ;;  %1748 = vpow2.f32 %v941_v2  ;;  %v947_v51 = vmul.f32 1.442695, %v926_v35 }
  0xda   : > { %v912_v52 = vmul.f32 %v892_v10, %v892_v10  ;;  %v1741_v56 = vpop.eup %1740  ;;  %v856_v57 = vmul.f32 %v2103_v54, %v840_v42  ;;  %v842_v58 = vmul.f32 0.039788734, %v1739_v47  ;;  %1750 = vpow2.f32 %v943_v43 }
  0xdb   : > { %v927_v60 = vmul.f32 -0.125, %v911_v46  ;;  %v1743_v61 = vpop.eup %1742  ;;  %v857_v63 = vmul.f32 %v2103_v54, %v841_v50  ;;  %v843_v49 = vmul.f32 0.039788734, %v1741_v56  ;;  %1752 = vpow2.f32 %v945_v45 }
  0xdc   : > { %v928_v24 = vmul.f32 -0.125, %v912_v52  ;;  %1457 = vst [vmem:[%s2105_s25 + $0x258] sm:$0xff] %v856_v57  ;;  %v858_v1 = vmul.f32 %v2103_v54, %v842_v58  ;;  %v844_v4 = vmul.f32 0.039788734, %v1743_v61  ;;  %1754 = vpow2.f32 %v947_v51 }
  0xdd   : > { %v949_v5 = vmul.f32 1.442695, %v927_v60  ;;  %1458 = vst [vmem:[%s2105_s25 + $0x260] sm:$0xff] %v857_v63  ;;  %v859_v6 = vmul.f32 %v2103_v54, %v843_v49  ;;  %v913_v8 = vmul.f32 %v893_v36, %v893_v36  ;;  %v895_v19 = vsub.f32 %v2127_v17, %v2442_v15 }
  0xde   : > { %v951_v7 = vmul.f32 1.442695, %v928_v24  ;;  %v1745_v13 = vpop.eup %1744  ;;  %1459 = vst [vmem:[%s2105_s25 + $0x268] sm:$0xff] %v858_v1  ;;  %v860_v16 = vmul.f32 %v2103_v54, %v844_v4  ;;  %v896_v27 = vsub.f32 %v2135_v39, %v2442_v15  ;;  %v914_v29 = vmul.f32 %v894_v9, %v894_v9 }
  0xdf   : > { %1756 = vpow2.f32 %v949_v5  ;;  %v1747_v23 = vpop.eup %1746  ;;  %1460 = vst [vmem:[%s2105_s25 + $0x270] sm:$0xff] %v859_v6  ;;  %v969_v28 = vmul.f32 0.039788734, %v1745_v13  ;;  %v929_v32 = vmul.f32 -0.125, %v913_v8  ;;  %v915_v25 = vmul.f32 %v895_v19, %v895_v19 }
  0xe0   : > { %1758 = vpow2.f32 %v951_v7  ;;  %1461 = vst [vmem:[%s2105_s25 + $0x278] sm:$0xff] %v860_v16  ;;  %v970_v40 = vmul.f32 0.039788734, %v1747_v23  ;;  %v916_v48 = vmul.f32 %v896_v27, %v896_v27  ;;  %v897_v54 = vsub.f32 %v2145_v53, %v2442_v15 }
  0xe1   : > { %v985_v31 = vmul.f32 %v2111_v62, %v969_v28  ;;  %v953_v44 = vmul.f32 1.442695, %v929_v32  ;;  %v930_v22 = vmul.f32 -0.125, %v914_v29  ;;  %v898_v26 = vsub.f32 %v2153_v11, %v2442_v15 }
  0xe2   : > { %v986_v2 = vmul.f32 %v2111_v62, %v970_v40  ;;  %v931_v35 = vmul.f32 -0.125, %v915_v25  ;;  %v932_v10 = vmul.f32 -0.125, %v916_v48  ;;  %v917_v36 = vmul.f32 %v897_v54, %v897_v54 }
  0xe3   : > { %v1749_v41 = vpop.eup %1748  ;;  %1462 = vst [vmem:[%s2105_s25 + $0x280] sm:$0xff] %v985_v31  ;;  %1760 = vpow2.f32 %v953_v44  ;;  %v955_v42 = vmul.f32 1.442695, %v930_v22  ;;  %v918_v43 = vmul.f32 %v898_v26, %v898_v26  ;;  %v899_v45 = vsub.f32 %v2168_v37, %v2442_v15 }
  0xe4   : > { %v1751_v46 = vpop.eup %1750  ;;  %1463 = vst [vmem:[%s2105_s25 + $0x288] sm:$0xff] %v986_v2  ;;  %v971_v47 = vmul.f32 0.039788734, %v1749_v41  ;;  %v957_v50 = vmul.f32 1.442695, %v931_v35  ;;  %v900_v52 = vsub.f32 %v2177_v55, %v2442_v15  ;;  %v933_v58 = vmul.f32 -0.125, %v917_v36 }
  0xe5   : > { %v959_v51 = vmul.f32 1.442695, %v932_v10  ;;  %v1753_v56 = vpop.eup %1752  ;;  %v972_v57 = vmul.f32 0.039788734, %v1751_v46  ;;  %1762 = vpow2.f32 %v955_v42  ;;  %v934_v60 = vmul.f32 -0.125, %v918_v43 }
  0xe6   : > { %v1755_v61 = vpop.eup %1754  ;;  %v987_v63 = vmul.f32 %v2111_v62, %v971_v47  ;;  %v973_v49 = vmul.f32 0.039788734, %v1753_v56  ;;  %1764 = vpow2.f32 %v957_v50  ;;  %v919_v24 = vmul.f32 %v899_v45, %v899_v45 }
  0xe7   : > { %v988_v1 = vmul.f32 %v2111_v62, %v972_v57  ;;  %v974_v4 = vmul.f32 0.039788734, %v1755_v61  ;;  %1766 = vpow2.f32 %v959_v51  ;;  %v961_v15 = vmul.f32 1.442695, %v933_v58 }
  0xe8   : > { %1464 = vst [vmem:[%s2105_s25 + $0x290] sm:$0xff] %v987_v63  ;;  %v989_v6 = vmul.f32 %v2111_v62, %v973_v49  ;;  %v963_v7 = vmul.f32 1.442695, %v934_v60  ;;  %v935_v8 = vmul.f32 -0.125, %v919_v24  ;;  %v920_v9 = vmul.f32 %v900_v52, %v900_v52 }
  0xe9   : > { %v1757_v5 = vpop.eup %1756  ;;  %1465 = vst [vmem:[%s2105_s25 + $0x298] sm:$0xff] %v988_v1  ;;  %v990_v16 = vmul.f32 %v2111_v62, %v974_v4  ;;  %1768 = vpow2.f32 %v961_v15  ;;  %v2517_v27 = vstv %s2501_s14 }
  0xea   : > { %v1759_v13 = vpop.eup %1758  ;;  %v975_v19 = vmul.f32 0.039788734, %v1757_v5  ;;  %1466 = vst [vmem:[%s2105_s25 + $0x2a0] sm:$0xff] %v989_v6  ;;  %1770 = vpow2.f32 %v963_v7  ;;  %v965_v28 = vmul.f32 1.442695, %v935_v8  ;;  %v936_v32 = vmul.f32 -0.125, %v920_v9 }
  0xeb   : > { %v976_v23 = vmul.f32 0.039788734, %v1759_v13  ;;  %1467 = vst [vmem:[%s2105_s25 + $0x2a8] sm:$0xff] %v990_v16  ;;  %v1025_v40 = vsub.f32 %v2037_v20, %v2517_v27  ;;  %v1026_v25 = vsub.f32 %v2055_v30, %v2517_v27  ;;  %v1027_v48 = vsub.f32 %v2058_v33, %v2517_v27 }
  0xec   : > { %v991_v29 = vmul.f32 %v2111_v62, %v975_v19  ;;  %1772 = vpow2.f32 %v965_v28  ;;  %v967_v31 = vmul.f32 1.442695, %v936_v32  ;;  %v1028_v44 = vsub.f32 %v2060_v34, %v2517_v27 }
  0xed   : > { %v992_v54 = vmul.f32 %v2111_v62, %v976_v23  ;;  %v1761_v22 = vpop.eup %1760  ;;  %v1045_v26 = vmul.f32 %v1025_v40, %v1025_v40  ;;  %v1046_v2 = vmul.f32 %v1026_v25, %v1026_v25  ;;  %v1047_v35 = vmul.f32 %v1027_v48, %v1027_v48 }
  0xee   : > { %1468 = vst [vmem:[%s2105_s25 + $0x2b0] sm:$0xff] %v991_v29  ;;  %v1029_v10 = vsub.f32 %v2073_v18, %v2517_v27  ;;  %v977_v36 = vmul.f32 0.039788734, %v1761_v22  ;;  %1774 = vpow2.f32 %v967_v31  ;;  %v1048_v41 = vmul.f32 %v1028_v44, %v1028_v44 }
  0xef   : > { %1469 = vst [vmem:[%s2105_s25 + $0x2b8] sm:$0xff] %v992_v54  ;;  %v1030_v42 = vsub.f32 %v2077_v21, %v2517_v27  ;;  %v1763_v43 = vpop.eup %1762  ;;  %v1061_v45 = vmul.f32 -0.125, %v1045_v26  ;;  %v1062_v46 = vmul.f32 -0.125, %v1046_v2  ;;  %v1063_v47 = vmul.f32 -0.125, %v1047_v35 }
  0xf0   : > { %v1049_v50 = vmul.f32 %v1029_v10, %v1029_v10  ;;  %v1765_v51 = vpop.eup %1764  ;;  %v993_v52 = vmul.f32 %v2111_v62, %v977_v36  ;;  %v978_v56 = vmul.f32 0.039788734, %v1763_v43  ;;  %v1064_v57 = vmul.f32 -0.125, %v1048_v41 }
  0xf1   : > { %v1050_v58 = vmul.f32 %v1030_v42, %v1030_v42  ;;  %v1767_v60 = vpop.eup %1766  ;;  %v979_v61 = vmul.f32 0.039788734, %v1765_v51  ;;  %v1077_v63 = vmul.f32 1.442695, %v1061_v45  ;;  %v1079_v49 = vmul.f32 1.442695, %v1062_v46 }
  0xf2   : > { %v1031_v24 = vsub.f32 %v2089_v38, %v2517_v27  ;;  %1470 = vst [vmem:[%s2105_s25 + $0x2c0] sm:$0xff] %v993_v52  ;;  %v994_v1 = vmul.f32 %v2111_v62, %v978_v56  ;;  %v980_v4 = vmul.f32 0.039788734, %v1767_v60  ;;  %v1081_v15 = vmul.f32 1.442695, %v1063_v47 }
  0xf3   : > { %v1083_v5 = vmul.f32 1.442695, %v1064_v57  ;;  %v1769_v6 = vpop.eup %1768  ;;  %v995_v7 = vmul.f32 %v2111_v62, %v979_v61  ;;  %1776 = vpow2.f32 %v1077_v63  ;;  %v1065_v8 = vmul.f32 -0.125, %v1049_v50 }
  0xf4   : > { %v1066_v9 = vmul.f32 -0.125, %v1050_v58  ;;  %v1771_v13 = vpop.eup %1770  ;;  %1471 = vst [vmem:[%s2105_s25 + $0x2c8] sm:$0xff] %v994_v1  ;;  %v996_v16 = vmul.f32 %v2111_v62, %v980_v4  ;;  %v981_v19 = vmul.f32 0.039788734, %v1769_v6  ;;  %1778 = vpow2.f32 %v1079_v49 }
  0xf5   : > { %v1051_v23 = vmul.f32 %v1031_v24, %v1031_v24  ;;  %1472 = vst [vmem:[%s2105_s25 + $0x2d0] sm:$0xff] %v995_v7  ;;  %v982_v28 = vmul.f32 0.039788734, %v1771_v13  ;;  %1780 = vpow2.f32 %v1081_v15  ;;  %v1085_v32 = vmul.f32 1.442695, %v1065_v8 }
  0xf6   : > { %v1087_v29 = vmul.f32 1.442695, %v1066_v9  ;;  %v1773_v40 = vpop.eup %1772  ;;  %1473 = vst [vmem:[%s2105_s25 + $0x2d8] sm:$0xff] %v996_v16  ;;  %v997_v25 = vmul.f32 %v2111_v62, %v981_v19  ;;  %1782 = vpow2.f32 %v1083_v5  ;;  %v1032_v54 = vsub.f32 %v2108_v59, %v2517_v27 }
  0xf7   : > { %v1067_v48 = vmul.f32 -0.125, %v1051_v23  ;;  %v998_v31 = vmul.f32 %v2111_v62, %v982_v28  ;;  %v983_v44 = vmul.f32 0.039788734, %v1773_v40  ;;  %1784 = vpow2.f32 %v1085_v32 }
  0xf8   : > { %v1033_v22 = vsub.f32 %v2113_v0, %v2517_v27  ;;  %v1775_v26 = vpop.eup %1774  ;;  %1474 = vst [vmem:[%s2105_s25 + $0x2e0] sm:$0xff] %v997_v25  ;;  %1786 = vpow2.f32 %v1087_v29  ;;  %v1052_v35 = vmul.f32 %v1032_v54, %v1032_v54  ;;  %v1034_v10 = vsub.f32 %v2122_v12, %v2517_v27 }
  0xf9   : > { %v1089_v2 = vmul.f32 1.442695, %v1067_v48  ;;  %1475 = vst [vmem:[%s2105_s25 + $0x2e8] sm:$0xff] %v998_v31  ;;  %v999_v36 = vmul.f32 %v2111_v62, %v983_v44  ;;  %v984_v41 = vmul.f32 0.039788734, %v1775_v26  ;;  %v1035_v43 = vsub.f32 %v2127_v17, %v2517_v27 }
  0xfa   : > { %v1053_v42 = vmul.f32 %v1033_v22, %v1033_v22  ;;  %v1068_v45 = vmul.f32 -0.125, %v1052_v35  ;;  %v1054_v46 = vmul.f32 %v1034_v10, %v1034_v10  ;;  %v1036_v47 = vsub.f32 %v2135_v39, %v2517_v27 }
  0xfb   : > { %1788 = vpow2.f32 %v1089_v2  ;;  %1476 = vst [vmem:[%s2105_s25 + $0x2f0] sm:$0xff] %v999_v36  ;;  %v1000_v50 = vmul.f32 %v2111_v62, %v984_v41  ;;  %v1055_v52 = vmul.f32 %v1035_v43, %v1035_v43  ;;  %v1037_v56 = vsub.f32 %v2145_v53, %v2517_v27 }
  0xfc   : > { %v1069_v51 = vmul.f32 -0.125, %v1053_v42  ;;  %v1091_v57 = vmul.f32 1.442695, %v1068_v45  ;;  %v1070_v58 = vmul.f32 -0.125, %v1054_v46  ;;  %v1056_v60 = vmul.f32 %v1036_v47, %v1036_v47 }
  0xfd   : > { %v1038_v61 = vsub.f32 %v2153_v11, %v2517_v27  ;;  %v1777_v63 = vpop.eup %1776  ;;  %1477 = vst [vmem:[%s2105_s25 + $0x2f8] sm:$0xff] %v1000_v50  ;;  %v1071_v24 = vmul.f32 -0.125, %v1055_v52  ;;  %v1057_v1 = vmul.f32 %v1037_v56, %v1037_v56  ;;  %v1039_v62 = vsub.f32 %v2168_v37, %v2517_v27 }
  0xfe   : > { %v1093_v49 = vmul.f32 1.442695, %v1069_v51  ;;  %v1779_v4 = vpop.eup %1778  ;;  %v1109_v15 = vmul.f32 0.039788734, %v1777_v63  ;;  %1790 = vpow2.f32 %v1091_v57  ;;  %v1095_v5 = vmul.f32 1.442695, %v1070_v58 }
  0xff   : > { %v1072_v6 = vmul.f32 -0.125, %v1056_v60  ;;  %v1781_v7 = vpop.eup %1780  ;;  %v1110_v8 = vmul.f32 0.039788734, %v1779_v4  ;;  %v1097_v9 = vmul.f32 1.442695, %v1071_v24  ;;  %v1073_v13 = vmul.f32 -0.125, %v1057_v1 }
 0x100   : > { %1792 = vpow2.f32 %v1093_v49  ;;  %v1783_v16 = vpop.eup %1782  ;;  %v1125_v19 = vmul.f32 %v2115_v3, %v1109_v15  ;;  %v1111_v23 = vmul.f32 0.039788734, %v1781_v7  ;;  %v1058_v44 = vmul.f32 %v1038_v61, %v1038_v61 }
 0x101   : > { %1794 = vpow2.f32 %v1095_v5  ;;  %v1099_v28 = vmul.f32 1.442695, %v1072_v6  ;;  %v1785_v32 = vpop.eup %1784  ;;  %v1126_v29 = vmul.f32 %v2115_v3, %v1110_v8  ;;  %v1112_v40 = vmul.f32 0.039788734, %v1783_v16 }
 0x102   : > { %1796 = vpow2.f32 %v1097_v9  ;;  %v1101_v25 = vmul.f32 1.442695, %v1073_v13  ;;  %v1787_v48 = vpop.eup %1786  ;;  %1478 = vst [vmem:[%s2105_s25 + $0x300] sm:$0xff] %v1125_v19  ;;  %v1127_v54 = vmul.f32 %v2115_v3, %v1111_v23  ;;  %v1113_v31 = vmul.f32 0.039788734, %v1785_v32 }
 0x103   : > { %1798 = vpow2.f32 %v1099_v28  ;;  %1479 = vst [vmem:[%s2105_s25 + $0x308] sm:$0xff] %v1126_v29  ;;  %v1128_v22 = vmul.f32 %v2115_v3, %v1112_v40  ;;  %v1114_v26 = vmul.f32 0.039788734, %v1787_v48  ;;  %v1059_v2 = vmul.f32 %v1039_v62, %v1039_v62 }
 0x104   : > { %1800 = vpow2.f32 %v1101_v25  ;;  %1480 = vst [vmem:[%s2105_s25 + $0x310] sm:$0xff] %v1127_v54  ;;  %v1129_v10 = vmul.f32 %v2115_v3, %v1113_v31  ;;  %v1074_v36 = vmul.f32 -0.125, %v1058_v44  ;;  %v1040_v41 = vsub.f32 %v2177_v55, %v2517_v27 }
 0x105   : > { %v1789_v35 = vpop.eup %1788  ;;  %v2585_v42 = vstv %s2569_s24  ;;  %1481 = vst [vmem:[%s2105_s25 + $0x318] sm:$0xff] %v1128_v22  ;;  %v1130_v43 = vmul.f32 %v2115_v3, %v1114_v26  ;;  %v1075_v46 = vmul.f32 -0.125, %v1059_v2 }
 0x106   : > { %v1115_v45 = vmul.f32 0.039788734, %v1789_v35  ;;  %v1165_v47 = vsub.f32 %v2037_v20, %v2585_v42  ;;  %1482 = vst [vmem:[%s2105_s25 + $0x320] sm:$0xff] %v1129_v10  ;;  %v1103_v50 = vmul.f32 1.442695, %v1074_v36  ;;  %v1060_v51 = vmul.f32 %v1040_v41, %v1040_v41 }
 0x107   : > { %v1166_v52 = vsub.f32 %v2055_v30, %v2585_v42  ;;  %v1167_v27 = vsub.f32 %v2058_v33, %v2585_v42  ;;  %1483 = vst [vmem:[%s2105_s25 + $0x328] sm:$0xff] %v1130_v43  ;;  %v1105_v57 = vmul.f32 1.442695, %v1075_v46  ;;  %v1168_v60 = vsub.f32 %v2060_v34, %v2585_v42 }
 0x108   : > { %v1131_v56 = vmul.f32 %v2115_v3, %v1115_v45  ;;  %v1185_v58 = vmul.f32 %v1165_v47, %v1165_v47  ;;  %v1791_v61 = vpop.eup %1790  ;;  %1802 = vpow2.f32 %v1103_v50  ;;  %v1076_v20 = vmul.f32 -0.125, %v1060_v51 }
 0x109   : > { %v1186_v63 = vmul.f32 %v1166_v52, %v1166_v52  ;;  %v1187_v49 = vmul.f32 %v1167_v27, %v1167_v27  ;;  %v1116_v1 = vmul.f32 0.039788734, %v1791_v61  ;;  %1804 = vpow2.f32 %v1105_v57 }
 0x10a   : > { %v1793_v24 = vpop.eup %1792  ;;  %1484 = vst [vmem:[%s2105_s25 + $0x330] sm:$0xff] %v1131_v56  ;;  %v1201_v30 = vmul.f32 -0.125, %v1185_v58  ;;  %v1188_v62 = vmul.f32 %v1168_v60, %v1168_v60  ;;  %v1107_v15 = vmul.f32 1.442695, %v1076_v20  ;;  %v1169_v22 = vsub.f32 %v2073_v18, %v2585_v42 }
 0x10b   : > { %v1795_v33 = vpop.eup %1794  ;;  %v1117_v4 = vmul.f32 0.039788734, %v1793_v24  ;;  %v1202_v5 = vmul.f32 -0.125, %v1186_v63  ;;  %v1203_v6 = vmul.f32 -0.125, %v1187_v49  ;;  %v1132_v34 = vmul.f32 %v2115_v3, %v1116_v1 }
 0x10c   : > { %v1797_v7 = vpop.eup %1796  ;;  %v1118_v8 = vmul.f32 0.039788734, %v1795_v33  ;;  %v1217_v9 = vmul.f32 1.442695, %v1201_v30  ;;  %v1204_v13 = vmul.f32 -0.125, %v1188_v62  ;;  %1806 = vpow2.f32 %v1107_v15 }
 0x10d   : > { %v1799_v16 = vpop.eup %1798  ;;  %v1133_v19 = vmul.f32 %v2115_v3, %v1117_v4  ;;  %v1119_v23 = vmul.f32 0.039788734, %v1797_v7  ;;  %v1219_v28 = vmul.f32 1.442695, %v1202_v5  ;;  %1485 = vst [vmem:[%s2105_s25 + $0x338] sm:$0xff] %v1132_v34  ;;  %v1170_v26 = vsub.f32 %v2077_v21, %v2585_v42 }
 0x10e   : > { %v1801_v32 = vpop.eup %1800  ;;  %v1134_v29 = vmul.f32 %v2115_v3, %v1118_v8  ;;  %v1120_v40 = vmul.f32 0.039788734, %v1799_v16  ;;  %1808 = vpow2.f32 %v1217_v9  ;;  %v1221_v25 = vmul.f32 1.442695, %v1203_v6 }
 0x10f   : > { %1486 = vst [vmem:[%s2105_s25 + $0x340] sm:$0xff] %v1133_v19  ;;  %v1135_v48 = vmul.f32 %v2115_v3, %v1119_v23  ;;  %v1121_v54 = vmul.f32 0.039788734, %v1801_v32  ;;  %1810 = vpow2.f32 %v1219_v28  ;;  %v1223_v31 = vmul.f32 1.442695, %v1204_v13 }
 0x110   : > { %1487 = vst [vmem:[%s2105_s25 + $0x348] sm:$0xff] %v1134_v29  ;;  %v1136_v44 = vmul.f32 %v2115_v3, %v1120_v40  ;;  %1812 = vpow2.f32 %v1221_v25  ;;  %v1171_v35 = vsub.f32 %v2089_v38, %v2585_v42  ;;  %v1172_v10 = vsub.f32 %v2108_v59, %v2585_v42 }
 0x111   : > { %1488 = vst [vmem:[%s2105_s25 + $0x350] sm:$0xff] %v1135_v48  ;;  %v1137_v2 = vmul.f32 %v2115_v3, %v1121_v54  ;;  %1814 = vpow2.f32 %v1223_v31  ;;  %v1189_v36 = vmul.f32 %v1169_v22, %v1169_v22  ;;  %v1190_v41 = vmul.f32 %v1170_v26, %v1170_v26 }
 0x112   : > { %1489 = vst [vmem:[%s2105_s25 + $0x358] sm:$0xff] %v1136_v44  ;;  %v1173_v43 = vsub.f32 %v2113_v0, %v2585_v42  ;;  %v1174_v18 = vsub.f32 %v2122_v12, %v2585_v42  ;;  %v1803_v21 = vpop.eup %1802  ;;  %v1191_v45 = vmul.f32 %v1171_v35, %v1171_v35  ;;  %v1192_v46 = vmul.f32 %v1172_v10, %v1172_v10 }
 0x113   : > { %1490 = vst [vmem:[%s2105_s25 + $0x360] sm:$0xff] %v1137_v2  ;;  %v1175_v47 = vsub.f32 %v2127_v17, %v2585_v42  ;;  %v1176_v38 = vsub.f32 %v2135_v39, %v2585_v42  ;;  %v1805_v59 = vpop.eup %1804  ;;  %v1122_v50 = vmul.f32 0.039788734, %v1803_v21  ;;  %v1205_v51 = vmul.f32 -0.125, %v1189_v36 }
 0x114   : > { %v1206_v52 = vmul.f32 -0.125, %v1190_v41  ;;  %v1193_v27 = vmul.f32 %v1173_v43, %v1173_v43  ;;  %v1123_v0 = vmul.f32 0.039788734, %v1805_v59  ;;  %v1207_v56 = vmul.f32 -0.125, %v1191_v45 }
 0x115   : > { %v1208_v57 = vmul.f32 -0.125, %v1192_v46  ;;  %v1194_v12 = vmul.f32 %v1174_v18, %v1174_v18  ;;  %v1138_v58 = vmul.f32 %v2115_v3, %v1122_v50  ;;  %v1225_v60 = vmul.f32 1.442695, %v1205_v51 }
 0x116   : > { %v1227_v61 = vmul.f32 1.442695, %v1206_v52  ;;  %v1209_v20 = vmul.f32 -0.125, %v1193_v27  ;;  %v1807_v17 = vpop.eup %1806  ;;  %v1139_v63 = vmul.f32 %v2115_v3, %v1123_v0  ;;  %v1229_v39 = vmul.f32 1.442695, %v1207_v56 }
 0x117   : > { %v1231_v49 = vmul.f32 1.442695, %v1208_v57  ;;  %v1210_v24 = vmul.f32 -0.125, %v1194_v12  ;;  %1491 = vst [vmem:[%s2105_s25 + $0x368] sm:$0xff] %v1138_v58  ;;  %v1124_v30 = vmul.f32 0.039788734, %v1807_v17  ;;  %1816 = vpow2.f32 %v1225_v60 }
 0x118   : > { %v1809_v1 = vpop.eup %1808  ;;  %v1233_v62 = vmul.f32 1.442695, %v1209_v20  ;;  %v1195_v33 = vmul.f32 %v1175_v47, %v1175_v47  ;;  %1492 = vst [vmem:[%s2105_s25 + $0x370] sm:$0xff] %v1139_v63  ;;  %1818 = vpow2.f32 %v1227_v61  ;;  %v1196_v6 = vmul.f32 %v1176_v38, %v1176_v38 }
 0x119   : > { %v1811_v4 = vpop.eup %1810  ;;  %v1249_v15 = vmul.f32 0.039788734, %v1809_v1  ;;  %v1235_v5 = vmul.f32 1.442695, %v1210_v24  ;;  %v1140_v34 = vmul.f32 %v2115_v3, %v1124_v30  ;;  %1820 = vpow2.f32 %v1229_v39 }
 0x11a   : > { %v1813_v7 = vpop.eup %1812  ;;  %v1250_v8 = vmul.f32 0.039788734, %v1811_v4  ;;  %v1211_v9 = vmul.f32 -0.125, %v1195_v33  ;;  %1822 = vpow2.f32 %v1231_v49  ;;  %v1212_v23 = vmul.f32 -0.125, %v1196_v6 }
 0x11b   : > { %v1815_v13 = vpop.eup %1814  ;;  %v1265_v16 = vmul.f32 %v2125_v14, %v1249_v15  ;;  %v1251_v19 = vmul.f32 0.039788734, %v1813_v7  ;;  %1493 = vst [vmem:[%s2105_s25 + $0x378] sm:$0xff] %v1140_v34  ;;  %1824 = vpow2.f32 %v1233_v62  ;;  %v1177_v25 = vsub.f32 %v2145_v53, %v2585_v42 }
 0x11c   : > { %v1266_v28 = vmul.f32 %v2125_v14, %v1250_v8  ;;  %v1252_v32 = vmul.f32 0.039788734, %v1815_v13  ;;  %v1237_v29 = vmul.f32 1.442695, %v1211_v9  ;;  %1826 = vpow2.f32 %v1235_v5 }
 0x11d   : > { %1494 = vst [vmem:[%s2105_s25 + $0x380] sm:$0xff] %v1265_v16  ;;  %v1267_v3 = vmul.f32 %v2125_v14, %v1251_v19  ;;  %v1239_v40 = vmul.f32 1.442695, %v1212_v23  ;;  %v1178_v54 = vsub.f32 %v2153_v11, %v2585_v42  ;;  %v1179_v31 = vsub.f32 %v2168_v37, %v2585_v42 }
 0x11e   : > { %1495 = vst [vmem:[%s2105_s25 + $0x388] sm:$0xff] %v1266_v28  ;;  %v1268_v48 = vmul.f32 %v2125_v14, %v1252_v32  ;;  %1828 = vpow2.f32 %v1237_v29  ;;  %v1197_v44 = vmul.f32 %v1177_v25, %v1177_v25  ;;  %v1180_v22 = vsub.f32 %v2177_v55, %v2585_v42 }
 0x11f   : > { %1496 = vst [vmem:[%s2105_s25 + $0x390] sm:$0xff] %v1267_v3  ;;  %1830 = vpow2.f32 %v1239_v40  ;;  %v1198_v26 = vmul.f32 %v1178_v54, %v1178_v54  ;;  %v1199_v2 = vmul.f32 %v1179_v31, %v1179_v31 }
 0x120   : > { %1497 = vst [vmem:[%s2105_s25 + $0x398] sm:$0xff] %v1268_v48  ;;  %v1213_v53 = vmul.f32 -0.125, %v1197_v44  ;;  %v1200_v35 = vmul.f32 %v1180_v22, %v1180_v22 }
 0x121   : > { %v1817_v10 = vpop.eup %1816  ;;  %v1214_v36 = vmul.f32 -0.125, %v1198_v26  ;;  %v1215_v41 = vmul.f32 -0.125, %v1199_v2 }
 0x122   : > { %v1819_v43 = vpop.eup %1818  ;;  %v1253_v18 = vmul.f32 0.039788734, %v1817_v10  ;;  %v1241_v11 = vmul.f32 1.442695, %v1213_v53  ;;  %v1216_v21 = vmul.f32 -0.125, %v1200_v35 }
 0x123   : > { %v1821_v37 = vpop.eup %1820  ;;  %v1254_v45 = vmul.f32 0.039788734, %v1819_v43  ;;  %v1243_v46 = vmul.f32 1.442695, %v1214_v36  ;;  %v1245_v47 = vmul.f32 1.442695, %v1215_v41 }
 0x124   : > { %v1823_v38 = vpop.eup %1822  ;;  %v1269_v55 = vmul.f32 %v2125_v14, %v1253_v18  ;;  %v1255_v42 = vmul.f32 0.039788734, %v1821_v37  ;;  %1832 = vpow2.f32 %v1241_v11  ;;  %v1247_v59 = vmul.f32 1.442695, %v1216_v21 }
 0x125   : > { %v1825_v50 = vpop.eup %1824  ;;  %v1270_v51 = vmul.f32 %v2125_v14, %v1254_v45  ;;  %v1256_v52 = vmul.f32 0.039788734, %v1823_v38  ;;  %1834 = vpow2.f32 %v1243_v46 }
 0x126   : > { %v1827_v27 = vpop.eup %1826  ;;  %1498 = vst [vmem:[%s2105_s25 + $0x3a0] sm:$0xff] %v1269_v55  ;;  %v1271_v0 = vmul.f32 %v2125_v14, %v1255_v42  ;;  %v1257_v56 = vmul.f32 0.039788734, %v1825_v50  ;;  %1836 = vpow2.f32 %v1245_v47 }
 0x127   : > { %1499 = vst [vmem:[%s2105_s25 + $0x3a8] sm:$0xff] %v1270_v51  ;;  %v1272_v12 = vmul.f32 %v2125_v14, %v1256_v52  ;;  %v1258_v58 = vmul.f32 0.039788734, %v1827_v27  ;;  %1838 = vpow2.f32 %v1247_v59 }
 0x128   : > { %v1829_v57 = vpop.eup %1828  ;;  %1500 = vst [vmem:[%s2105_s25 + $0x3b0] sm:$0xff] %v1271_v0  ;;  %v1273_v61 = vmul.f32 %v2125_v14, %v1257_v56 }
 0x129   : > { %v1831_v60 = vpop.eup %1830  ;;  %v1259_v20 = vmul.f32 0.039788734, %v1829_v57  ;;  %1501 = vst [vmem:[%s2105_s25 + $0x3b8] sm:$0xff] %v1272_v12  ;;  %v1274_v17 = vmul.f32 %v2125_v14, %v1258_v58 }
 0x12a   : > { %v1260_v63 = vmul.f32 0.039788734, %v1831_v60  ;;  %1502 = vst [vmem:[%s2105_s25 + $0x3c0] sm:$0xff] %v1273_v61 }
 0x12b   : > { %v1275_v39 = vmul.f32 %v2125_v14, %v1259_v20  ;;  %1503 = vst [vmem:[%s2105_s25 + $0x3c8] sm:$0xff] %v1274_v17 }
 0x12c   : > { %v1276_v49 = vmul.f32 %v2125_v14, %v1260_v63 }
 0x12d   : > { %1504 = vst [vmem:[%s2105_s25 + $0x3d0] sm:$0xff] %v1275_v39 }
 0x12e   : > { %1505 = vst [vmem:[%s2105_s25 + $0x3d8] sm:$0xff] %v1276_v49  ;;  %v1833_v24 = vpop.eup %1832 }
 0x12f   : > { %v1835_v1 = vpop.eup %1834  ;;  %v1261_v30 = vmul.f32 0.039788734, %v1833_v24 }
 0x130   : > { %v1837_v62 = vpop.eup %1836  ;;  %v1262_v33 = vmul.f32 0.039788734, %v1835_v1 }
 0x131   : > { %v1839_v4 = vpop.eup %1838  ;;  %v1277_v15 = vmul.f32 %v2125_v14, %v1261_v30  ;;  %v1263_v5 = vmul.f32 0.039788734, %v1837_v62 }
 0x132   : > { %v1278_v6 = vmul.f32 %v2125_v14, %v1262_v33  ;;  %v1264_v7 = vmul.f32 0.039788734, %v1839_v4 }
 0x133   : > { %1506 = vst [vmem:[%s2105_s25 + $0x3e0] sm:$0xff] %v1277_v15  ;;  %v1279_v34 = vmul.f32 %v2125_v14, %v1263_v5 }
 0x134   : > { %1507 = vst [vmem:[%s2105_s25 + $0x3e8] sm:$0xff] %v1278_v6  ;;  %v1280_v8 = vmul.f32 %v2125_v14, %v1264_v7 }
 0x135   : > { %1508 = vst [vmem:[%s2105_s25 + $0x3f0] sm:$0xff] %v1279_v34 }
 0x136   : > { %1509 = vst [vmem:[%s2105_s25 + $0x3f8] sm:$0xff] %v1280_v8 }
 0x137   : > { %1868 = shalt.err (!%p1865_p1)
}
 0x138   : > { %s1869_s22 = scalar_lea.hbm %s2676_s26, 16384  ;;  %s1873_s3 = scalar_lea.hbm %s2728_s1, 32768 }
 0x139   : > { %p1870_p2 = scmp.ne.s32.totalorder %s2676_s26, %s1869_s22  ;;  %p1874_p7 = scmp.lt.u32.totalorder %s2676_s26, %s2728_s1 }
 0x13a   : > { %p1875_p8 = scmp.lt.u32.totalorder %s1873_s3, %s1869_s22  ;;  %p1877_p10 = scmp.lt.u32.totalorder %s1869_s22, %s2676_s26 }
 0x13b   : > { %p1871_p3 = pnand %p1870_p2, %p1975_p5 }
 0x13c   : > { %p1876_p9 = por %p1875_p8, %p1874_p7 }
 0x13d   : > { %p1872_p4 = pneg %p1871_p3 }
 0x13e   : > { %p1878_p11 = por %p1877_p10, %p1876_p9 }
 0x140   : > { %p1879_p12 = pnand %p1878_p11, %p1872_p4 }
 0x142   : > { %1882 = shalt.err (!%p1879_p12)
}
 0x143   : > { %s1925_s11 = smov 128   ;;  %s1926_s13 = smov 8  }
 0x144   : > { %1520 = dma.vmem_to_hbm [thread:$0]  (%p1975_p5), %s2678_s20, 16384, %s2676_s26, %s2686_s10, %s1925_s11, %s1925_s11, %s1926_s13  }
 0x145 PF: > { %p1532_p13 = scmp.ge.s32.totalorder %s1921_s9, 2  ;;  %s1327_s14 = sand.u32 1, %s1909_s6  }
 0x146   : > { %s1328_s18 = scalar_lea.sflag [#allocation3], %s1327_s14 }
 0x147   : > { %p1527_p0 = pnand %p1532_p13, %p1979_p6 }
 0x149   : > { %1904 = dma.done.wait (!%p1527_p0), %s1328_s18, 16384  }
 0x14a   : > { %1906 = vsyncadd (!%p1527_p0), %s1328_s18, 4294950912  ;;  %p12_p1 = scmp.ge.s32.totalorder %s1962_s12, 4   ;;  %s2732_s6 = smov %s1913_s7 }
 0x14b   : > { %s2733_s7 = smov %s1917_s8  ;;  %s2734_s8 = smov %s1973_s15 }
 0x14c   : > { %s2735_s9 = smov %s1962_s12  ;;  %14 = sbr.rel (!%p12_p1) target bundleno = 4 (0x4), region = 68 }
 0x153   :  { %1333 = vsyncpa [#allocation3], 1 }
 0x154   :  { %1335 = vsyncpa [#allocation3 + $0x1], 1 }
 0x155   :  { %1336 = vsyncpa [#allocation4], 1 }
 0x156   :  { %1338 = vsyncpa [#allocation4 + $0x1], 1 }

</bundles_post_ra>
